<compile_context>
chip_gen: v5e
topology: v5e:2x2
jax: 0.10.0
libtpu: 0.0.40
codegen_flags: <defaults>
</compile_context>

<pallas_src>
import functools

import jax
import jax.numpy as jnp
from jax.experimental import pallas as pl
from jax.experimental.pallas import tpu as pltpu


def _soft_threshold(x, theta):
    # prox_theta: sign(x) * max(|x| - theta, 0), written with only max/sub.
    return jnp.maximum(x - theta, 0.0) - jnp.maximum(-x - theta, 0.0)


def ista_llt_kernel(inv_L_ref, theta_ref, x_ref, a_ref, zs_ref, *, num_iters):
    # inv_L_ref, theta_ref: (T,) f32 in SMEM
    # x_ref: (bt, m, n), a_ref: (bt, m, k) in VMEM; zs_ref: (bt, T, k, n)
    A = a_ref[...]                      # (bt, m, k), f32
    X = x_ref[...]                      # (bt, m, n), f32
    bt, m, k = A.shape
    n = X.shape[2]

    # Hoisted out of the T loop: one transpose + two batched matmuls per step.
    AT = jnp.swapaxes(A, 1, 2)          # (bt, k, m)
    G = jnp.einsum("bkm,bmj->bkj", AT, A,
                   preferred_element_type=jnp.float32)          # (bt, k, k)
    C = jnp.einsum("bkm,bmn->bkn", AT, X,
                   preferred_element_type=jnp.float32)          # (bt, k, n)

    Z = jnp.zeros((bt, k, n), jnp.float32)
    # T is small and static -> unrolled Python loop (one MXU matmul per step).
    # TODO(synk): switch to lax.fori_loop with a dynamic Z_s store if T >> 16.
    for t in range(num_iters):
        grad = jnp.einsum("bij,bjn->bin", G, Z,
                          preferred_element_type=jnp.float32) - C  # (bt, k, n)
        Z = _soft_threshold(Z - inv_L_ref[t] * grad, theta_ref[t])
        zs_ref[:, t] = Z


def ista_llt(X, A, L, theta, *, batch_tile=8):
    """Pallas implementation of ISTA_LLT.forward (Z_0=None, noise_A=None)."""
    b, m, n = X.shape
    k = A.shape[2]
    num_iters = int(L.shape[0])

    X = X.astype(jnp.float32)
    A = A.astype(jnp.float32)
    inv_L = (1.0 / L).astype(jnp.float32)       # reciprocal precomputed on host
    theta = theta.astype(jnp.float32)

    bt = min(batch_tile, b)
    grid = (pl.cdiv(b, bt),)

    kernel = functools.partial(ista_llt_kernel, num_iters=num_iters)

    grid_spec = pltpu.PrefetchScalarGridSpec(
        num_scalar_prefetch=0,
        grid=grid,
        in_specs=[
            pl.BlockSpec(memory_space=pltpu.MemorySpace.SMEM),          # inv_L
            pl.BlockSpec(memory_space=pltpu.MemorySpace.SMEM),          # theta
            pl.BlockSpec((bt, m, n), lambda i: (i, 0, 0)),              # X
            pl.BlockSpec((bt, m, k), lambda i: (i, 0, 0)),              # A
        ],
        out_specs=pl.BlockSpec((bt, num_iters, k, n),
                               lambda i: (i, 0, 0, 0)),                 # Z_s
    )

    # Explicit VMEM budget: double-buffered inputs + output block, with headroom.
    per_step_bytes = 4 * (bt * (m * n + m * k) + bt * num_iters * k * n)
    vmem_limit = int(min(max(8 * per_step_bytes, 16 << 20), 48 << 20))

    flops = b * (2 * m * k * k + 2 * m * k * n
                 + num_iters * (2 * k * k * n + 6 * k * n))
    bytes_accessed = 4 * (b * m * n + b * m * k + b * num_iters * k * n)
    cost = pl.CostEstimate(flops=flops, transcendentals=0,
                           bytes_accessed=bytes_accessed)

    Z_s = pl.pallas_call(
        kernel,
        out_shape=jax.ShapeDtypeStruct((b, num_iters, k, n), jnp.float32),
        grid_spec=grid_spec,
        compiler_params=pltpu.CompilerParams(
            dimension_semantics=("parallel",),
            vmem_limit_bytes=vmem_limit,
        ),
        cost_estimate=cost,
    )(inv_L, theta, X, A)

    Z = Z_s[:, -1]                              # final iterate == Z_s[:, T-1]
    return Z, Z_s


def ista_llt_ref(X, A, L, theta):
    """Plain-JAX reference matching the PyTorch forward (two bmm per step)."""
    b, m, n = X.shape
    k = A.shape[2]
    Z = jnp.zeros((b, k, n), jnp.float32)
    zs = []
    for t in range(L.shape[0]):
        AZ = jnp.einsum("bmk,bkn->bmn", A, Z)
        grad = jnp.einsum("bmk,bmn->bkn", A, AZ - X)   # A^T (A Z - X)
        Z = jnp.sign(Z - (1.0 / L[t]) * grad) * jnp.maximum(
            jnp.abs(Z - (1.0 / L[t]) * grad) - theta[t], 0.0)
        zs.append(Z)
    return Z, jnp.stack(zs, axis=1)


if __name__ == "__main__":
    T = 10
    b, m, k, n = 2, 16, 32, 8

    # Deterministic "parameters" exactly as in ISTA_LLT.__init__ (L_shared=False,
    # theta_shared=False): L = [1.0]*T, theta = [0.001]*T.
    L = jnp.ones((T,), jnp.float32)
    theta = jnp.full((T,), 0.001, jnp.float32)

    key = jax.random.PRNGKey(0)
    kx, ka = jax.random.split(key)
    X = jax.random.normal(kx, (b, m, n), jnp.float32)
    # scale A so the ISTA iteration is well-conditioned (||A^T A|| < 1)
    A = jax.random.normal(ka, (b, m, k), jnp.float32) * (0.1 / jnp.sqrt(m))

    Z, Z_s = ista_llt(X, A, L, theta)
    jax.block_until_ready((Z, Z_s))

    Z_ref, Z_s_ref = ista_llt_ref(X, A, L, theta)
    assert Z.shape == (b, k, n) and Z_s.shape == (b, T, k, n)
    assert jnp.allclose(Z, Z_ref, rtol=1e-5, atol=1e-5)
    assert jnp.allclose(Z_s, Z_s_ref, rtol=1e-5, atol=1e-5)

    print("KERNEL_OK")
</pallas_src>

<mosaic_0001>
module attributes {stable_mosaic.version = 11 : i64} {
  func.func @ista_llt_kernel(%arg0: i32, %arg1: memref<10xf32, #tpu.memory_space<smem>>, %arg2: memref<10xf32, #tpu.memory_space<smem>>, %arg3: memref<2x16x8xf32, #tpu.memory_space<vmem>>, %arg4: memref<2x16x32xf32, #tpu.memory_space<vmem>>, %arg5: memref<2x10x32x8xf32, #tpu.memory_space<vmem>>) attributes {dimension_semantics = [#tpu.dimension_semantics<parallel>], iteration_bounds = array<i64: 1>, scalar_prefetch = 0 : i64, scratch_operands = 0 : i64, tpu.core_type = #tpu.core_type<tc>, window_params = [{transform_indices = @transform_0, window_bounds = array<i64: 10>}, {transform_indices = @transform_1, window_bounds = array<i64: 10>}, {transform_indices = @transform_2, window_bounds = array<i64: 2, 16, 8>}, {transform_indices = @transform_3, window_bounds = array<i64: 2, 16, 32>}, {transform_indices = @transform_4, window_bounds = array<i64: 2, 10, 32, 8>}]} {
    %c0 = arith.constant 0 : index
    %c0_0 = arith.constant 0 : index
    %c0_1 = arith.constant 0 : index
    %0 = vector.load %arg4[%c0, %c0_0, %c0_1] : memref<2x16x32xf32, #tpu.memory_space<vmem>>, vector<2x16x32xf32>
    %c0_2 = arith.constant 0 : index
    %c0_3 = arith.constant 0 : index
    %c0_4 = arith.constant 0 : index
    %1 = vector.load %arg3[%c0_2, %c0_3, %c0_4] : memref<2x16x8xf32, #tpu.memory_space<vmem>>, vector<2x16x8xf32>
    %2 = tpu.transpose %0, [0, 2, 1] : vector<2x16x32xf32> -> vector<2x32x16xf32>
    "tpu.trace_start"() <{level = 10 : i32, message = "bkm,bmj->bkj"}> : () -> ()
    %cst = arith.constant dense<0.000000e+00> : vector<2x32x32xf32>
    %3 = tpu.matmul %2, %0, %cst {dimension_numbers = #tpu.dot_dimension_numbers<[2], [1], [1], [2], [0, 0, 0, 1, 1, 2], [0], [0]>} : vector<2x32x16xf32>, vector<2x16x32xf32>, vector<2x32x32xf32> -> vector<2x32x32xf32>
    "tpu.trace_stop"() : () -> ()
    "tpu.trace_start"() <{level = 10 : i32, message = "bkm,bmn->bkn"}> : () -> ()
    %cst_5 = arith.constant dense<0.000000e+00> : vector<2x32x8xf32>
    %4 = tpu.matmul %2, %1, %cst_5 {dimension_numbers = #tpu.dot_dimension_numbers<[2], [1], [1], [2], [0, 0, 0, 1, 1, 2], [0], [0]>} : vector<2x32x16xf32>, vector<2x16x8xf32>, vector<2x32x8xf32> -> vector<2x32x8xf32>
    %cst_6 = arith.constant 0.000000e+00 : f32
    "tpu.trace_stop"() : () -> ()
    %5 = vector.broadcast %cst_6 : f32 to vector<2x32x8xf32>
    "tpu.trace_start"() <{level = 10 : i32, message = "bij,bjn->bin"}> : () -> ()
    %cst_7 = arith.constant dense<0.000000e+00> : vector<2x32x8xf32>
    %6 = tpu.matmul %3, %5, %cst_7 {dimension_numbers = #tpu.dot_dimension_numbers<[2], [1], [1], [2], [0, 0, 0, 1, 1, 2], [0], [0]>} : vector<2x32x32xf32>, vector<2x32x8xf32>, vector<2x32x8xf32> -> vector<2x32x8xf32>
    "tpu.trace_stop"() : () -> ()
    %7 = arith.subf %6, %4 : vector<2x32x8xf32>
    %c0_8 = arith.constant 0 : index
    %8 = memref.load %arg1[%c0_8] : memref<10xf32, #tpu.memory_space<smem>>
    %9 = vector.broadcast %8 : f32 to vector<2x32x8xf32>
    %10 = arith.mulf %9, %7 : vector<2x32x8xf32>
    %11 = arith.subf %5, %10 : vector<2x32x8xf32>
    %c0_9 = arith.constant 0 : index
    %12 = memref.load %arg2[%c0_9] : memref<10xf32, #tpu.memory_space<smem>>
    %13 = vector.broadcast %12 : f32 to vector<2x32x8xf32>
    %14 = arith.subf %11, %13 : vector<2x32x8xf32>
    %cst_10 = arith.constant 0.000000e+00 : f32
    %15 = vector.broadcast %cst_10 : f32 to vector<2x32x8xf32>
    %16 = arith.maximumf %14, %15 : vector<2x32x8xf32>
    %cst_11 = arith.constant 0.000000e+00 : f32
    %17 = vector.broadcast %cst_11 : f32 to vector<2x32x8xf32>
    %18 = arith.subf %17, %11 : vector<2x32x8xf32>
    %19 = vector.broadcast %12 : f32 to vector<2x32x8xf32>
    %20 = arith.subf %18, %19 : vector<2x32x8xf32>
    %cst_12 = arith.constant 0.000000e+00 : f32
    %21 = vector.broadcast %cst_12 : f32 to vector<2x32x8xf32>
    %22 = arith.maximumf %20, %21 : vector<2x32x8xf32>
    %23 = arith.subf %16, %22 : vector<2x32x8xf32>
    %c0_13 = arith.constant 0 : index
    %c0_14 = arith.constant 0 : index
    %c0_15 = arith.constant 0 : index
    %c0_16 = arith.constant 0 : index
    %24 = vector.load %arg5[%c0_13, %c0_14, %c0_15, %c0_16] : memref<2x10x32x8xf32, #tpu.memory_space<vmem>>, vector<2x1x32x8xf32>
    %25 = vector.shape_cast %24 : vector<2x1x32x8xf32> to vector<2x32x8xf32>
    %26 = vector.shape_cast %23 : vector<2x32x8xf32> to vector<2x1x32x8xf32>
    tpu.vector_store %arg5[%c0_13, %c0_14, %c0_15, %c0_16], %26 {strides = array<i32>} : memref<2x10x32x8xf32, #tpu.memory_space<vmem>>, vector<2x1x32x8xf32>,
    "tpu.trace_start"() <{level = 10 : i32, message = "bij,bjn->bin"}> : () -> ()
    %cst_17 = arith.constant dense<0.000000e+00> : vector<2x32x8xf32>
    %27 = tpu.matmul %3, %23, %cst_17 {dimension_numbers = #tpu.dot_dimension_numbers<[2], [1], [1], [2], [0, 0, 0, 1, 1, 2], [0], [0]>} : vector<2x32x32xf32>, vector<2x32x8xf32>, vector<2x32x8xf32> -> vector<2x32x8xf32>
    "tpu.trace_stop"() : () -> ()
    %28 = arith.subf %27, %4 : vector<2x32x8xf32>
    %c1 = arith.constant 1 : index
    %29 = memref.load %arg1[%c1] : memref<10xf32, #tpu.memory_space<smem>>
    %30 = vector.broadcast %29 : f32 to vector<2x32x8xf32>
    %31 = arith.mulf %30, %28 : vector<2x32x8xf32>
    %32 = arith.subf %23, %31 : vector<2x32x8xf32>
    %c1_18 = arith.constant 1 : index
    %33 = memref.load %arg2[%c1_18] : memref<10xf32, #tpu.memory_space<smem>>
    %34 = vector.broadcast %33 : f32 to vector<2x32x8xf32>
    %35 = arith.subf %32, %34 : vector<2x32x8xf32>
    %cst_19 = arith.constant 0.000000e+00 : f32
    %36 = vector.broadcast %cst_19 : f32 to vector<2x32x8xf32>
    %37 = arith.maximumf %35, %36 : vector<2x32x8xf32>
    %cst_20 = arith.constant 0.000000e+00 : f32
    %38 = vector.broadcast %cst_20 : f32 to vector<2x32x8xf32>
    %39 = arith.subf %38, %32 : vector<2x32x8xf32>
    %40 = vector.broadcast %33 : f32 to vector<2x32x8xf32>
    %41 = arith.subf %39, %40 : vector<2x32x8xf32>
    %cst_21 = arith.constant 0.000000e+00 : f32
    %42 = vector.broadcast %cst_21 : f32 to vector<2x32x8xf32>
    %43 = arith.maximumf %41, %42 : vector<2x32x8xf32>
    %44 = arith.subf %37, %43 : vector<2x32x8xf32>
    %c0_22 = arith.constant 0 : index
    %c1_23 = arith.constant 1 : index
    %c0_24 = arith.constant 0 : index
    %c0_25 = arith.constant 0 : index
    %45 = vector.load %arg5[%c0_22, %c1_23, %c0_24, %c0_25] : memref<2x10x32x8xf32, #tpu.memory_space<vmem>>, vector<2x1x32x8xf32>
    %46 = vector.shape_cast %45 : vector<2x1x32x8xf32> to vector<2x32x8xf32>
    %47 = vector.shape_cast %44 : vector<2x32x8xf32> to vector<2x1x32x8xf32>
    tpu.vector_store %arg5[%c0_22, %c1_23, %c0_24, %c0_25], %47 {strides = array<i32>} : memref<2x10x32x8xf32, #tpu.memory_space<vmem>>, vector<2x1x32x8xf32>,
    "tpu.trace_start"() <{level = 10 : i32, message = "bij,bjn->bin"}> : () -> ()
    %cst_26 = arith.constant dense<0.000000e+00> : vector<2x32x8xf32>
    %48 = tpu.matmul %3, %44, %cst_26 {dimension_numbers = #tpu.dot_dimension_numbers<[2], [1], [1], [2], [0, 0, 0, 1, 1, 2], [0], [0]>} : vector<2x32x32xf32>, vector<2x32x8xf32>, vector<2x32x8xf32> -> vector<2x32x8xf32>
    "tpu.trace_stop"() : () -> ()
    %49 = arith.subf %48, %4 : vector<2x32x8xf32>
    %c2 = arith.constant 2 : index
    %50 = memref.load %arg1[%c2] : memref<10xf32, #tpu.memory_space<smem>>
    %51 = vector.broadcast %50 : f32 to vector<2x32x8xf32>
    %52 = arith.mulf %51, %49 : vector<2x32x8xf32>
    %53 = arith.subf %44, %52 : vector<2x32x8xf32>
    %c2_27 = arith.constant 2 : index
    %54 = memref.load %arg2[%c2_27] : memref<10xf32, #tpu.memory_space<smem>>
    %55 = vector.broadcast %54 : f32 to vector<2x32x8xf32>
    %56 = arith.subf %53, %55 : vector<2x32x8xf32>
    %cst_28 = arith.constant 0.000000e+00 : f32
    %57 = vector.broadcast %cst_28 : f32 to vector<2x32x8xf32>
    %58 = arith.maximumf %56, %57 : vector<2x32x8xf32>
    %cst_29 = arith.constant 0.000000e+00 : f32
    %59 = vector.broadcast %cst_29 : f32 to vector<2x32x8xf32>
    %60 = arith.subf %59, %53 : vector<2x32x8xf32>
    %61 = vector.broadcast %54 : f32 to vector<2x32x8xf32>
    %62 = arith.subf %60, %61 : vector<2x32x8xf32>
    %cst_30 = arith.constant 0.000000e+00 : f32
    %63 = vector.broadcast %cst_30 : f32 to vector<2x32x8xf32>
    %64 = arith.maximumf %62, %63 : vector<2x32x8xf32>
    %65 = arith.subf %58, %64 : vector<2x32x8xf32>
    %c0_31 = arith.constant 0 : index
    %c2_32 = arith.constant 2 : index
    %c0_33 = arith.constant 0 : index
    %c0_34 = arith.constant 0 : index
    %66 = vector.load %arg5[%c0_31, %c2_32, %c0_33, %c0_34] : memref<2x10x32x8xf32, #tpu.memory_space<vmem>>, vector<2x1x32x8xf32>
    %67 = vector.shape_cast %66 : vector<2x1x32x8xf32> to vector<2x32x8xf32>
    %68 = vector.shape_cast %65 : vector<2x32x8xf32> to vector<2x1x32x8xf32>
    tpu.vector_store %arg5[%c0_31, %c2_32, %c0_33, %c0_34], %68 {strides = array<i32>} : memref<2x10x32x8xf32, #tpu.memory_space<vmem>>, vector<2x1x32x8xf32>,
    "tpu.trace_start"() <{level = 10 : i32, message = "bij,bjn->bin"}> : () -> ()
    %cst_35 = arith.constant dense<0.000000e+00> : vector<2x32x8xf32>
    %69 = tpu.matmul %3, %65, %cst_35 {dimension_numbers = #tpu.dot_dimension_numbers<[2], [1], [1], [2], [0, 0, 0, 1, 1, 2], [0], [0]>} : vector<2x32x32xf32>, vector<2x32x8xf32>, vector<2x32x8xf32> -> vector<2x32x8xf32>
    "tpu.trace_stop"() : () -> ()
    %70 = arith.subf %69, %4 : vector<2x32x8xf32>
    %c3 = arith.constant 3 : index
    %71 = memref.load %arg1[%c3] : memref<10xf32, #tpu.memory_space<smem>>
    %72 = vector.broadcast %71 : f32 to vector<2x32x8xf32>
    %73 = arith.mulf %72, %70 : vector<2x32x8xf32>
    %74 = arith.subf %65, %73 : vector<2x32x8xf32>
    %c3_36 = arith.constant 3 : index
    %75 = memref.load %arg2[%c3_36] : memref<10xf32, #tpu.memory_space<smem>>
    %76 = vector.broadcast %75 : f32 to vector<2x32x8xf32>
    %77 = arith.subf %74, %76 : vector<2x32x8xf32>
    %cst_37 = arith.constant 0.000000e+00 : f32
    %78 = vector.broadcast %cst_37 : f32 to vector<2x32x8xf32>
    %79 = arith.maximumf %77, %78 : vector<2x32x8xf32>
    %cst_38 = arith.constant 0.000000e+00 : f32
    %80 = vector.broadcast %cst_38 : f32 to vector<2x32x8xf32>
    %81 = arith.subf %80, %74 : vector<2x32x8xf32>
    %82 = vector.broadcast %75 : f32 to vector<2x32x8xf32>
    %83 = arith.subf %81, %82 : vector<2x32x8xf32>
    %cst_39 = arith.constant 0.000000e+00 : f32
    %84 = vector.broadcast %cst_39 : f32 to vector<2x32x8xf32>
    %85 = arith.maximumf %83, %84 : vector<2x32x8xf32>
    %86 = arith.subf %79, %85 : vector<2x32x8xf32>
    %c0_40 = arith.constant 0 : index
    %c3_41 = arith.constant 3 : index
    %c0_42 = arith.constant 0 : index
    %c0_43 = arith.constant 0 : index
    %87 = vector.load %arg5[%c0_40, %c3_41, %c0_42, %c0_43] : memref<2x10x32x8xf32, #tpu.memory_space<vmem>>, vector<2x1x32x8xf32>
    %88 = vector.shape_cast %87 : vector<2x1x32x8xf32> to vector<2x32x8xf32>
    %89 = vector.shape_cast %86 : vector<2x32x8xf32> to vector<2x1x32x8xf32>
    tpu.vector_store %arg5[%c0_40, %c3_41, %c0_42, %c0_43], %89 {strides = array<i32>} : memref<2x10x32x8xf32, #tpu.memory_space<vmem>>, vector<2x1x32x8xf32>,
    "tpu.trace_start"() <{level = 10 : i32, message = "bij,bjn->bin"}> : () -> ()
    %cst_44 = arith.constant dense<0.000000e+00> : vector<2x32x8xf32>
    %90 = tpu.matmul %3, %86, %cst_44 {dimension_numbers = #tpu.dot_dimension_numbers<[2], [1], [1], [2], [0, 0, 0, 1, 1, 2], [0], [0]>} : vector<2x32x32xf32>, vector<2x32x8xf32>, vector<2x32x8xf32> -> vector<2x32x8xf32>
    "tpu.trace_stop"() : () -> ()
    %91 = arith.subf %90, %4 : vector<2x32x8xf32>
    %c4 = arith.constant 4 : index
    %92 = memref.load %arg1[%c4] : memref<10xf32, #tpu.memory_space<smem>>
    %93 = vector.broadcast %92 : f32 to vector<2x32x8xf32>
    %94 = arith.mulf %93, %91 : vector<2x32x8xf32>
    %95 = arith.subf %86, %94 : vector<2x32x8xf32>
    %c4_45 = arith.constant 4 : index
    %96 = memref.load %arg2[%c4_45] : memref<10xf32, #tpu.memory_space<smem>>
    %97 = vector.broadcast %96 : f32 to vector<2x32x8xf32>
    %98 = arith.subf %95, %97 : vector<2x32x8xf32>
    %cst_46 = arith.constant 0.000000e+00 : f32
    %99 = vector.broadcast %cst_46 : f32 to vector<2x32x8xf32>
    %100 = arith.maximumf %98, %99 : vector<2x32x8xf32>
    %cst_47 = arith.constant 0.000000e+00 : f32
    %101 = vector.broadcast %cst_47 : f32 to vector<2x32x8xf32>
    %102 = arith.subf %101, %95 : vector<2x32x8xf32>
    %103 = vector.broadcast %96 : f32 to vector<2x32x8xf32>
    %104 = arith.subf %102, %103 : vector<2x32x8xf32>
    %cst_48 = arith.constant 0.000000e+00 : f32
    %105 = vector.broadcast %cst_48 : f32 to vector<2x32x8xf32>
    %106 = arith.maximumf %104, %105 : vector<2x32x8xf32>
    %107 = arith.subf %100, %106 : vector<2x32x8xf32>
    %c0_49 = arith.constant 0 : index
    %c4_50 = arith.constant 4 : index
    %c0_51 = arith.constant 0 : index
    %c0_52 = arith.constant 0 : index
    %108 = vector.load %arg5[%c0_49, %c4_50, %c0_51, %c0_52] : memref<2x10x32x8xf32, #tpu.memory_space<vmem>>, vector<2x1x32x8xf32>
    %109 = vector.shape_cast %108 : vector<2x1x32x8xf32> to vector<2x32x8xf32>
    %110 = vector.shape_cast %107 : vector<2x32x8xf32> to vector<2x1x32x8xf32>
    tpu.vector_store %arg5[%c0_49, %c4_50, %c0_51, %c0_52], %110 {strides = array<i32>} : memref<2x10x32x8xf32, #tpu.memory_space<vmem>>, vector<2x1x32x8xf32>,
    "tpu.trace_start"() <{level = 10 : i32, message = "bij,bjn->bin"}> : () -> ()
    %cst_53 = arith.constant dense<0.000000e+00> : vector<2x32x8xf32>
    %111 = tpu.matmul %3, %107, %cst_53 {dimension_numbers = #tpu.dot_dimension_numbers<[2], [1], [1], [2], [0, 0, 0, 1, 1, 2], [0], [0]>} : vector<2x32x32xf32>, vector<2x32x8xf32>, vector<2x32x8xf32> -> vector<2x32x8xf32>
    "tpu.trace_stop"() : () -> ()
    %112 = arith.subf %111, %4 : vector<2x32x8xf32>
    %c5 = arith.constant 5 : index
    %113 = memref.load %arg1[%c5] : memref<10xf32, #tpu.memory_space<smem>>
    %114 = vector.broadcast %113 : f32 to vector<2x32x8xf32>
    %115 = arith.mulf %114, %112 : vector<2x32x8xf32>
    %116 = arith.subf %107, %115 : vector<2x32x8xf32>
    %c5_54 = arith.constant 5 : index
    %117 = memref.load %arg2[%c5_54] : memref<10xf32, #tpu.memory_space<smem>>
    %118 = vector.broadcast %117 : f32 to vector<2x32x8xf32>
    %119 = arith.subf %116, %118 : vector<2x32x8xf32>
    %cst_55 = arith.constant 0.000000e+00 : f32
    %120 = vector.broadcast %cst_55 : f32 to vector<2x32x8xf32>
    %121 = arith.maximumf %119, %120 : vector<2x32x8xf32>
    %cst_56 = arith.constant 0.000000e+00 : f32
    %122 = vector.broadcast %cst_56 : f32 to vector<2x32x8xf32>
    %123 = arith.subf %122, %116 : vector<2x32x8xf32>
    %124 = vector.broadcast %117 : f32 to vector<2x32x8xf32>
    %125 = arith.subf %123, %124 : vector<2x32x8xf32>
    %cst_57 = arith.constant 0.000000e+00 : f32
    %126 = vector.broadcast %cst_57 : f32 to vector<2x32x8xf32>
    %127 = arith.maximumf %125, %126 : vector<2x32x8xf32>
    %128 = arith.subf %121, %127 : vector<2x32x8xf32>
    %c0_58 = arith.constant 0 : index
    %c5_59 = arith.constant 5 : index
    %c0_60 = arith.constant 0 : index
    %c0_61 = arith.constant 0 : index
    %129 = vector.load %arg5[%c0_58, %c5_59, %c0_60, %c0_61] : memref<2x10x32x8xf32, #tpu.memory_space<vmem>>, vector<2x1x32x8xf32>
    %130 = vector.shape_cast %129 : vector<2x1x32x8xf32> to vector<2x32x8xf32>
    %131 = vector.shape_cast %128 : vector<2x32x8xf32> to vector<2x1x32x8xf32>
    tpu.vector_store %arg5[%c0_58, %c5_59, %c0_60, %c0_61], %131 {strides = array<i32>} : memref<2x10x32x8xf32, #tpu.memory_space<vmem>>, vector<2x1x32x8xf32>,
    "tpu.trace_start"() <{level = 10 : i32, message = "bij,bjn->bin"}> : () -> ()
    %cst_62 = arith.constant dense<0.000000e+00> : vector<2x32x8xf32>
    %132 = tpu.matmul %3, %128, %cst_62 {dimension_numbers = #tpu.dot_dimension_numbers<[2], [1], [1], [2], [0, 0, 0, 1, 1, 2], [0], [0]>} : vector<2x32x32xf32>, vector<2x32x8xf32>, vector<2x32x8xf32> -> vector<2x32x8xf32>
    "tpu.trace_stop"() : () -> ()
    %133 = arith.subf %132, %4 : vector<2x32x8xf32>
    %c6 = arith.constant 6 : index
    %134 = memref.load %arg1[%c6] : memref<10xf32, #tpu.memory_space<smem>>
    %135 = vector.broadcast %134 : f32 to vector<2x32x8xf32>
    %136 = arith.mulf %135, %133 : vector<2x32x8xf32>
    %137 = arith.subf %128, %136 : vector<2x32x8xf32>
    %c6_63 = arith.constant 6 : index
    %138 = memref.load %arg2[%c6_63] : memref<10xf32, #tpu.memory_space<smem>>
    %139 = vector.broadcast %138 : f32 to vector<2x32x8xf32>
    %140 = arith.subf %137, %139 : vector<2x32x8xf32>
    %cst_64 = arith.constant 0.000000e+00 : f32
    %141 = vector.broadcast %cst_64 : f32 to vector<2x32x8xf32>
    %142 = arith.maximumf %140, %141 : vector<2x32x8xf32>
    %cst_65 = arith.constant 0.000000e+00 : f32
    %143 = vector.broadcast %cst_65 : f32 to vector<2x32x8xf32>
    %144 = arith.subf %143, %137 : vector<2x32x8xf32>
    %145 = vector.broadcast %138 : f32 to vector<2x32x8xf32>
    %146 = arith.subf %144, %145 : vector<2x32x8xf32>
    %cst_66 = arith.constant 0.000000e+00 : f32
    %147 = vector.broadcast %cst_66 : f32 to vector<2x32x8xf32>
    %148 = arith.maximumf %146, %147 : vector<2x32x8xf32>
    %149 = arith.subf %142, %148 : vector<2x32x8xf32>
    %c0_67 = arith.constant 0 : index
    %c6_68 = arith.constant 6 : index
    %c0_69 = arith.constant 0 : index
    %c0_70 = arith.constant 0 : index
    %150 = vector.load %arg5[%c0_67, %c6_68, %c0_69, %c0_70] : memref<2x10x32x8xf32, #tpu.memory_space<vmem>>, vector<2x1x32x8xf32>
    %151 = vector.shape_cast %150 : vector<2x1x32x8xf32> to vector<2x32x8xf32>
    %152 = vector.shape_cast %149 : vector<2x32x8xf32> to vector<2x1x32x8xf32>
    tpu.vector_store %arg5[%c0_67, %c6_68, %c0_69, %c0_70], %152 {strides = array<i32>} : memref<2x10x32x8xf32, #tpu.memory_space<vmem>>, vector<2x1x32x8xf32>,
    "tpu.trace_start"() <{level = 10 : i32, message = "bij,bjn->bin"}> : () -> ()
    %cst_71 = arith.constant dense<0.000000e+00> : vector<2x32x8xf32>
    %153 = tpu.matmul %3, %149, %cst_71 {dimension_numbers = #tpu.dot_dimension_numbers<[2], [1], [1], [2], [0, 0, 0, 1, 1, 2], [0], [0]>} : vector<2x32x32xf32>, vector<2x32x8xf32>, vector<2x32x8xf32> -> vector<2x32x8xf32>
    "tpu.trace_stop"() : () -> ()
    %154 = arith.subf %153, %4 : vector<2x32x8xf32>
    %c7 = arith.constant 7 : index
    %155 = memref.load %arg1[%c7] : memref<10xf32, #tpu.memory_space<smem>>
    %156 = vector.broadcast %155 : f32 to vector<2x32x8xf32>
    %157 = arith.mulf %156, %154 : vector<2x32x8xf32>
    %158 = arith.subf %149, %157 : vector<2x32x8xf32>
    %c7_72 = arith.constant 7 : index
    %159 = memref.load %arg2[%c7_72] : memref<10xf32, #tpu.memory_space<smem>>
    %160 = vector.broadcast %159 : f32 to vector<2x32x8xf32>
    %161 = arith.subf %158, %160 : vector<2x32x8xf32>
    %cst_73 = arith.constant 0.000000e+00 : f32
    %162 = vector.broadcast %cst_73 : f32 to vector<2x32x8xf32>
    %163 = arith.maximumf %161, %162 : vector<2x32x8xf32>
    %cst_74 = arith.constant 0.000000e+00 : f32
    %164 = vector.broadcast %cst_74 : f32 to vector<2x32x8xf32>
    %165 = arith.subf %164, %158 : vector<2x32x8xf32>
    %166 = vector.broadcast %159 : f32 to vector<2x32x8xf32>
    %167 = arith.subf %165, %166 : vector<2x32x8xf32>
    %cst_75 = arith.constant 0.000000e+00 : f32
    %168 = vector.broadcast %cst_75 : f32 to vector<2x32x8xf32>
    %169 = arith.maximumf %167, %168 : vector<2x32x8xf32>
    %170 = arith.subf %163, %169 : vector<2x32x8xf32>
    %c0_76 = arith.constant 0 : index
    %c7_77 = arith.constant 7 : index
    %c0_78 = arith.constant 0 : index
    %c0_79 = arith.constant 0 : index
    %171 = vector.load %arg5[%c0_76, %c7_77, %c0_78, %c0_79] : memref<2x10x32x8xf32, #tpu.memory_space<vmem>>, vector<2x1x32x8xf32>
    %172 = vector.shape_cast %171 : vector<2x1x32x8xf32> to vector<2x32x8xf32>
    %173 = vector.shape_cast %170 : vector<2x32x8xf32> to vector<2x1x32x8xf32>
    tpu.vector_store %arg5[%c0_76, %c7_77, %c0_78, %c0_79], %173 {strides = array<i32>} : memref<2x10x32x8xf32, #tpu.memory_space<vmem>>, vector<2x1x32x8xf32>,
    "tpu.trace_start"() <{level = 10 : i32, message = "bij,bjn->bin"}> : () -> ()
    %cst_80 = arith.constant dense<0.000000e+00> : vector<2x32x8xf32>
    %174 = tpu.matmul %3, %170, %cst_80 {dimension_numbers = #tpu.dot_dimension_numbers<[2], [1], [1], [2], [0, 0, 0, 1, 1, 2], [0], [0]>} : vector<2x32x32xf32>, vector<2x32x8xf32>, vector<2x32x8xf32> -> vector<2x32x8xf32>
    "tpu.trace_stop"() : () -> ()
    %175 = arith.subf %174, %4 : vector<2x32x8xf32>
    %c8 = arith.constant 8 : index
    %176 = memref.load %arg1[%c8] : memref<10xf32, #tpu.memory_space<smem>>
    %177 = vector.broadcast %176 : f32 to vector<2x32x8xf32>
    %178 = arith.mulf %177, %175 : vector<2x32x8xf32>
    %179 = arith.subf %170, %178 : vector<2x32x8xf32>
    %c8_81 = arith.constant 8 : index
    %180 = memref.load %arg2[%c8_81] : memref<10xf32, #tpu.memory_space<smem>>
    %181 = vector.broadcast %180 : f32 to vector<2x32x8xf32>
    %182 = arith.subf %179, %181 : vector<2x32x8xf32>
    %cst_82 = arith.constant 0.000000e+00 : f32
    %183 = vector.broadcast %cst_82 : f32 to vector<2x32x8xf32>
    %184 = arith.maximumf %182, %183 : vector<2x32x8xf32>
    %cst_83 = arith.constant 0.000000e+00 : f32
    %185 = vector.broadcast %cst_83 : f32 to vector<2x32x8xf32>
    %186 = arith.subf %185, %179 : vector<2x32x8xf32>
    %187 = vector.broadcast %180 : f32 to vector<2x32x8xf32>
    %188 = arith.subf %186, %187 : vector<2x32x8xf32>
    %cst_84 = arith.constant 0.000000e+00 : f32
    %189 = vector.broadcast %cst_84 : f32 to vector<2x32x8xf32>
    %190 = arith.maximumf %188, %189 : vector<2x32x8xf32>
    %191 = arith.subf %184, %190 : vector<2x32x8xf32>
    %c0_85 = arith.constant 0 : index
    %c8_86 = arith.constant 8 : index
    %c0_87 = arith.constant 0 : index
    %c0_88 = arith.constant 0 : index
    %192 = vector.load %arg5[%c0_85, %c8_86, %c0_87, %c0_88] : memref<2x10x32x8xf32, #tpu.memory_space<vmem>>, vector<2x1x32x8xf32>
    %193 = vector.shape_cast %192 : vector<2x1x32x8xf32> to vector<2x32x8xf32>
    %194 = vector.shape_cast %191 : vector<2x32x8xf32> to vector<2x1x32x8xf32>
    tpu.vector_store %arg5[%c0_85, %c8_86, %c0_87, %c0_88], %194 {strides = array<i32>} : memref<2x10x32x8xf32, #tpu.memory_space<vmem>>, vector<2x1x32x8xf32>,
    "tpu.trace_start"() <{level = 10 : i32, message = "bij,bjn->bin"}> : () -> ()
    %cst_89 = arith.constant dense<0.000000e+00> : vector<2x32x8xf32>
    %195 = tpu.matmul %3, %191, %cst_89 {dimension_numbers = #tpu.dot_dimension_numbers<[2], [1], [1], [2], [0, 0, 0, 1, 1, 2], [0], [0]>} : vector<2x32x32xf32>, vector<2x32x8xf32>, vector<2x32x8xf32> -> vector<2x32x8xf32>
    "tpu.trace_stop"() : () -> ()
    %196 = arith.subf %195, %4 : vector<2x32x8xf32>
    %c9 = arith.constant 9 : index
    %197 = memref.load %arg1[%c9] : memref<10xf32, #tpu.memory_space<smem>>
    %198 = vector.broadcast %197 : f32 to vector<2x32x8xf32>
    %199 = arith.mulf %198, %196 : vector<2x32x8xf32>
    %200 = arith.subf %191, %199 : vector<2x32x8xf32>
    %c9_90 = arith.constant 9 : index
    %201 = memref.load %arg2[%c9_90] : memref<10xf32, #tpu.memory_space<smem>>
    %202 = vector.broadcast %201 : f32 to vector<2x32x8xf32>
    %203 = arith.subf %200, %202 : vector<2x32x8xf32>
    %cst_91 = arith.constant 0.000000e+00 : f32
    %204 = vector.broadcast %cst_91 : f32 to vector<2x32x8xf32>
    %205 = arith.maximumf %203, %204 : vector<2x32x8xf32>
    %cst_92 = arith.constant 0.000000e+00 : f32
    %206 = vector.broadcast %cst_92 : f32 to vector<2x32x8xf32>
    %207 = arith.subf %206, %200 : vector<2x32x8xf32>
    %208 = vector.broadcast %201 : f32 to vector<2x32x8xf32>
    %209 = arith.subf %207, %208 : vector<2x32x8xf32>
    %cst_93 = arith.constant 0.000000e+00 : f32
    %210 = vector.broadcast %cst_93 : f32 to vector<2x32x8xf32>
    %211 = arith.maximumf %209, %210 : vector<2x32x8xf32>
    %212 = arith.subf %205, %211 : vector<2x32x8xf32>
    %c0_94 = arith.constant 0 : index
    %c9_95 = arith.constant 9 : index
    %c0_96 = arith.constant 0 : index
    %c0_97 = arith.constant 0 : index
    %213 = vector.load %arg5[%c0_94, %c9_95, %c0_96, %c0_97] : memref<2x10x32x8xf32, #tpu.memory_space<vmem>>, vector<2x1x32x8xf32>
    %214 = vector.shape_cast %213 : vector<2x1x32x8xf32> to vector<2x32x8xf32>
    %215 = vector.shape_cast %212 : vector<2x32x8xf32> to vector<2x1x32x8xf32>
    tpu.vector_store %arg5[%c0_94, %c9_95, %c0_96, %c0_97], %215 {strides = array<i32>} : memref<2x10x32x8xf32, #tpu.memory_space<vmem>>, vector<2x1x32x8xf32>,
    return
  }
  func.func @transform_0(%arg0: i32) -> i32 {
    %c0_i32 = arith.constant 0 : i32
    %c0_i32_0 = arith.constant 0 : i32
    return %c0_i32 : i32
  }
  func.func @transform_1(%arg0: i32) -> i32 {
    %c0_i32 = arith.constant 0 : i32
    %c0_i32_0 = arith.constant 0 : i32
    return %c0_i32 : i32
  }
  func.func @transform_2(%arg0: i32) -> (i32, i32, i32) {
    %c0_i32 = arith.constant 0 : i32
    %c0_i32_0 = arith.constant 0 : i32
    %c0_i32_1 = arith.constant 0 : i32
    return %arg0, %c0_i32, %c0_i32_0 : i32, i32, i32
  }
  func.func @transform_3(%arg0: i32) -> (i32, i32, i32) {
    %c0_i32 = arith.constant 0 : i32
    %c0_i32_0 = arith.constant 0 : i32
    %c0_i32_1 = arith.constant 0 : i32
    return %arg0, %c0_i32, %c0_i32_0 : i32, i32, i32
  }
  func.func @transform_4(%arg0: i32) -> (i32, i32, i32, i32) {
    %c0_i32 = arith.constant 0 : i32
    %c0_i32_0 = arith.constant 0 : i32
    %c0_i32_1 = arith.constant 0 : i32
    %c0_i32_2 = arith.constant 0 : i32
    return %arg0, %c0_i32, %c0_i32_0, %c0_i32_1 : i32, i32, i32, i32
  }
}

</mosaic_0001>

<bundles_post_ra>
// kernel: tpu_custom_call.1
= control target key start
LH: loop header
LB: loop body
LE: loop exit
PB: predicated region body
PF: predicated region fallthrough
CT: control target
= control target key end

     0   :  { %9 = vsyncpa [#allocation3], 0  ;;  %s3239_s0 = inlined_call_operand.vmem [shape: f32[10], index: 0, kind: input, shape index: {}]   ;;  %s3240_s1 = inlined_call_operand.vmem [shape: f32[10], index: 1, kind: input, shape index: {}]   ;;  %s3241_s2 = inlined_call_operand.vmem [shape: f32[2,16,8], index: 2, kind: input, shape index: {}]   ;;  %s3242_s3 = inlined_call_operand.vmem [shape: f32[2,16,32], index: 3, kind: input, shape index: {}]   ;;  %s3243_s4 = inlined_call_operand.vmem [shape: f32[2,10,32,8], index: 4, kind: output, shape index: {}]  }
   0x1   :  { %s16_s17 = sshll.u32 %s3239_s0, 4  ;;  %s17_s17 = int_to_ptr.vmem [resolvable:$true] %s16_s17 }
   0x2   :  { %10 = vsyncpa [#allocation5], 0  ;;  %s25_s20 = sshll.u32 %s3240_s1, 4  ;;  %s1933_s21 = smov [#allocation2]   ;;  %s26_s20 = int_to_ptr.vmem [resolvable:$true] %s25_s20 }
   0x3   :  { %19 = dma.vmem_to_smem %s17_s17, 16, %s1933_s21, [#allocation3]  }
   0x4   :  { %s1934_s22 = smov [#allocation4]  }
   0x5   :  { %28 = dma.vmem_to_smem %s26_s20, 16, %s1934_s22, [#allocation5]  }
   0x6   :  { %1929 = dma.done.wait [#allocation3], 16  }
   0x7   :  { %1930 = vsyncadd [#allocation3], 4294967280 }
   0x8   :  { %1931 = dma.done.wait [#allocation5], 16  }
   0x9   :  { %1932 = vsyncadd [#allocation5], 4294967280 }
   0xa   :  { %41 = sfence }
   0xb   :  { %v44_v0 = vld [vmem:[%s3242_s3 + $0x10] sm:$0xff]  ;;  %v42_v1 = vld [vmem:[%s3242_s3] sm:$0xff]  ;;  %v45_v2 = vld [vmem:[%s3242_s3 + $0x18] sm:$0xff]  ;;  %v1935_v8 = vmov 0.0   ;;  %vm114_vm0 = vcmask 130048   ;;  %vm255_vm1 = vcmask 261120  }
   0xc   :  { %82 = vxpose.xlu1.b32.start [1/2] (short) (narrow) %v44_v0, 32  ;;  %50 = vxpose.xlu0.b32.start [1/2] (short) (narrow) %v42_v1, 32  ;;  %v43_v3 = vld [vmem:[%s3242_s3 + $0x8] sm:$0xff]  ;;  %v49_v5 = vld [vmem:[%s3241_s2 + $0x18] sm:$0xff]  ;;  %v46_v6 = vld [vmem:[%s3241_s2] sm:$0xff]  ;;  %s364_s3 = sld [smem:[#allocation4]] }
   0xd   :  { %v47_v4 = vld [vmem:[%s3241_s2 + $0x8] sm:$0xff]  ;;  %141 = vmatpush.msra.mxu0 %v43_v3  ;;  %182 = vmatpush.msra.mxu1 %v45_v2  ;;  %v48_v7 = vld [vmem:[%s3241_s2 + $0x10] sm:$0xff]  ;;  %s346_s2 = sld [smem:[#allocation2]]  ;;  %vm414_vm2 = vcmask 64512  }
   0xe   :  { %211 = vmatpush.msra.mxu2 %v47_v4  ;;  %240 = vmatpush.msra.mxu3 %v49_v5  ;;  %s1748_s26 = sld [smem:[#allocation2 + $0x1]] }
   0xf   :  { %183 = vmatpush.msra.mxu1 %v44_v0  ;;  %142 = vmatpush.msra.mxu0 %v42_v1  ;;  %s1749_s1 = sld [smem:[#allocation4 + $0x1]] }
  0x10   :  { %212 = vmatpush.msra.mxu2 %v46_v6  ;;  %241 = vmatpush.msra.mxu3 %v48_v7  ;;  %s1766_s15 = sld [smem:[#allocation2 + $0x2]] }
  0x11   :  { %283 = vmatpush.msrb.mxu0 %v1935_v8  ;;  %324 = vmatpush.msrb.mxu1 %v1935_v8  ;;  %s1767_s16 = sld [smem:[#allocation4 + $0x2]] }
  0x12   :  { %v2053_v37 = vstv %s364_s3  ;;  %s1784_s5 = sld [smem:[#allocation2 + $0x3]] }
  0x13   :  { %v2043_v28 = vstv %s346_s2  ;;  %s1785_s6 = sld [smem:[#allocation4 + $0x3]] }
  0x14   :  { %83 = vxpose.xlu1.b32.end [2/2] (short) (narrow) %v45_v2, 32  ;;  %51 = vxpose.xlu0.b32.end [2/2] (short) (narrow) %v43_v3, 32  ;;  %s1802_s21 = sld [smem:[#allocation2 + $0x4]] }
  0x15   :  { %s1803_s22 = sld [smem:[#allocation4 + $0x4]] }
  0x16   :  { %s1820_s2 = sld [smem:[#allocation2 + $0x5]] }
  0x17   :  { %s1821_s3 = sld [smem:[#allocation4 + $0x5]] }
  0xb0   :  { %v98_v9 = vpop.trf.xlu1  ;;  %v66_v10 = vpop.trf.xlu0 }
  0xb1   :  { %1716 = vmatmul.msk.f32.vlgmr.msra.gmra.mxu0 %vm114_vm0, %v66_v10  ;;  %1720 = vmatmul.msk.f32.vlgmr.msra.gmra.mxu1 %vm114_vm0, %v98_v9 }
  0xb2   :  { %1724 = vmatmul.msk.f32.vlgmr.msra.gmra.mxu2 %vm114_vm0, %v66_v10  ;;  %1728 = vmatmul.msk.f32.vlgmr.msra.gmra.mxu3 %vm114_vm0, %v98_v9 }
  0xb8   :  { %v99_v11 = vpop.trf.xlu1  ;;  %v67_v12 = vpop.trf.xlu0 }
  0xb9   :  { %1717 = vmatmul.msk.f32.gmra.mxu0 %vm114_vm0, %v67_v12  ;;  %1721 = vmatmul.msk.f32.gmra.mxu1 %vm114_vm0, %v99_v11 }
  0xba   :  { %1725 = vmatmul.msk.f32.gmra.mxu2 %vm114_vm0, %v67_v12  ;;  %1729 = vmatmul.msk.f32.gmra.mxu3 %vm114_vm0, %v99_v11 }
  0xc0   :  { %v100_v13 = vpop.trf.xlu1  ;;  %v68_v14 = vpop.trf.xlu0 }
  0xc1   :  { %1718 = vmatmul.msk.f32.gmra.mxu0 %vm114_vm0, %v68_v14  ;;  %1722 = vmatmul.msk.f32.gmra.mxu1 %vm114_vm0, %v100_v13 }
  0xc2   :  { %1726 = vmatmul.msk.f32.gmra.mxu2 %vm114_vm0, %v68_v14  ;;  %1730 = vmatmul.msk.f32.gmra.mxu3 %vm114_vm0, %v100_v13 }
  0xc8   :  { %v101_v15 = vpop.trf.xlu1  ;;  %v69_v16 = vpop.trf.xlu0 }
  0xc9   :  { %1719 = vmatmul.msk.f32.gmra.mxu0 %vm114_vm0, %v69_v16  ;;  %1723 = vmatmul.msk.f32.gmra.mxu1 %vm114_vm0, %v101_v15 }
  0xca   :  { %1727 = vmatmul.msk.f32.gmra.mxu2 %vm114_vm0, %v69_v16  ;;  %1731 = vmatmul.msk.f32.gmra.mxu3 %vm114_vm0, %v101_v15 }
 0x12e   :  { %v2007_v17 = vpop.f32.mrf.mxu0  ;;  %v2009_v18 = vpop.f32.mrf.mxu1 }
 0x12f   :  { %1732 = vmatmul.msk.f32.vlgmr.msrb.gmra.mxu0 %vm255_vm1, %v2007_v17  ;;  %1736 = vmatmul.msk.f32.vlgmr.msrb.gmra.mxu1 %vm255_vm1, %v2009_v18 }
 0x135   :  { %v2039_v25 = vpop.f32.mrf.mxu2  ;;  %v2041_v26 = vpop.f32.mrf.mxu3 }
 0x136   :  { %v2015_v19 = vpop.f32.mrf.mxu0  ;;  %v2017_v20 = vpop.f32.mrf.mxu1 }
 0x137   :  { %1733 = vmatmul.msk.f32.gmra.mxu0 %vm255_vm1, %v2015_v19  ;;  %1737 = vmatmul.msk.f32.gmra.mxu1 %vm255_vm1, %v2017_v20 }
 0x13d   :  { %v2047_v32 = vpop.f32.mrf.mxu2  ;;  %v2049_v33 = vpop.f32.mrf.mxu3 }
 0x13e   :  { %v2023_v21 = vpop.f32.mrf.mxu0  ;;  %v2025_v22 = vpop.f32.mrf.mxu1 }
 0x13f   :  { %1734 = vmatmul.msk.f32.gmra.mxu0 %vm255_vm1, %v2023_v21  ;;  %1738 = vmatmul.msk.f32.gmra.mxu1 %vm255_vm1, %v2025_v22 }
 0x145   :  { %v2063_v55 = vpop.f32.mrf.mxu2  ;;  %v2065_v56 = vpop.f32.mrf.mxu3 }
 0x146   :  { %v2031_v23 = vpop.f32.mrf.mxu0  ;;  %v2033_v24 = vpop.f32.mrf.mxu1 }
 0x147   :  { %1735 = vmatmul.msk.f32.gmra.mxu0 %vm255_vm1, %v2031_v23  ;;  %1739 = vmatmul.msk.f32.gmra.mxu1 %vm255_vm1, %v2033_v24 }
 0x1ac   :  { %v285_v27 = vpop.f32.mrf.mxu0  ;;  %v326_v29 = vpop.f32.mrf.mxu1 }
 0x1ad   :  { %v338_v30 = vsub.f32 %v285_v27, %v2039_v25  ;;  %v342_v31 = vsub.f32 %v326_v29, %v2041_v26  ;;  %v2093_v27 = vpop.f32.mrf.mxu2  ;;  %v2095_v29 = vpop.f32.mrf.mxu3 }
 0x1af   :  { %v348_v34 = vmul.f32 %v2043_v28, %v338_v30  ;;  %v352_v35 = vmul.f32 %v2043_v28, %v342_v31 }
 0x1b1   :  { %v356_v36 = vsub.f32 0.0, %v348_v34  ;;  %v360_v38 = vsub.f32 0.0, %v352_v35 }
 0x1b3   :  { %v382_v39 = vsub.f32 0.0, %v356_v36  ;;  %v386_v40 = vsub.f32 0.0, %v360_v38  ;;  %v366_v41 = vsub.f32 %v356_v36, %v2053_v37  ;;  %v370_v42 = vsub.f32 %v360_v38, %v2053_v37 }
 0x1b4   :  { %v288_v43 = vpop.f32.mrf.mxu0  ;;  %v329_v44 = vpop.f32.mrf.mxu1 }
 0x1b5   :  { %v339_v45 = vsub.f32 %v288_v43, %v2047_v32  ;;  %v343_v46 = vsub.f32 %v329_v44, %v2049_v33  ;;  %v390_v47 = vsub.f32 %v382_v39, %v2053_v37  ;;  %v394_v48 = vsub.f32 %v386_v40, %v2053_v37 }
 0x1b6   :  { %v374_v51 = vmax.f32 %v366_v41, 0.0  ;;  %v378_v52 = vmax.f32 %v370_v42, 0.0 }
 0x1b7   :  { %v349_v49 = vmul.f32 %v2043_v28, %v339_v45  ;;  %v353_v50 = vmul.f32 %v2043_v28, %v343_v46  ;;  %v398_v53 = vmax.f32 %v390_v47, 0.0  ;;  %v402_v54 = vmax.f32 %v394_v48, 0.0 }
 0x1b9   :  { %v357_v57 = vsub.f32 0.0, %v349_v49  ;;  %v361_v58 = vsub.f32 0.0, %v353_v50  ;;  %v2067_v59 = vsub.f32 %v374_v51, %v398_v53  ;;  %v2069_v60 = vsub.f32 %v378_v52, %v402_v54 }
 0x1bb   :  { %v383_v61 = vsub.f32 0.0, %v357_v57  ;;  %v387_v62 = vsub.f32 0.0, %v361_v58  ;;  %v367_v63 = vsub.f32 %v357_v57, %v2053_v37  ;;  %v371_v0 = vsub.f32 %v361_v58, %v2053_v37  ;;  %415 = vst.msk [vmem:[%s3243_s4] sm:$0xff] %vm414_vm2, %v2067_v59 }
 0x1bc   :  { %v291_v1 = vpop.f32.mrf.mxu0  ;;  %v332_v2 = vpop.f32.mrf.mxu1  ;;  %419 = vst.msk [vmem:[%s3243_s4 + $0x140] sm:$0xff] %vm414_vm2, %v2069_v60 }
 0x1bd   :  { %v340_v3 = vsub.f32 %v291_v1, %v2063_v55  ;;  %v344_v4 = vsub.f32 %v332_v2, %v2065_v56  ;;  %v391_v5 = vsub.f32 %v383_v61, %v2053_v37  ;;  %v395_v6 = vsub.f32 %v387_v62, %v2053_v37 }
 0x1be   :  { %v375_v9 = vmax.f32 %v367_v63, 0.0  ;;  %v379_v10 = vmax.f32 %v371_v0, 0.0 }
 0x1bf   :  { %v350_v7 = vmul.f32 %v2043_v28, %v340_v3  ;;  %v354_v8 = vmul.f32 %v2043_v28, %v344_v4  ;;  %v399_v11 = vmax.f32 %v391_v5, 0.0  ;;  %v403_v12 = vmax.f32 %v395_v6, 0.0 }
 0x1c0   :  { %v2171_v4 = vstv %s1748_s26  ;;  %s1838_s26 = sld [smem:[#allocation2 + $0x6]] }
 0x1c1   :  { %v358_v13 = vsub.f32 0.0, %v350_v7  ;;  %v362_v14 = vsub.f32 0.0, %v354_v8  ;;  %v2089_v15 = vsub.f32 %v375_v9, %v399_v11  ;;  %v2091_v16 = vsub.f32 %v379_v10, %v403_v12 }
 0x1c2   :  { %v2177_v10 = vstv %s1749_s1  ;;  %s1839_s1 = sld [smem:[#allocation4 + $0x6]] }
 0x1c3   :  { %v384_v30 = vsub.f32 0.0, %v358_v13  ;;  %v388_v31 = vsub.f32 0.0, %v362_v14  ;;  %v368_v34 = vsub.f32 %v358_v13, %v2053_v37  ;;  %v372_v35 = vsub.f32 %v362_v14, %v2053_v37  ;;  %416 = vst.msk [vmem:[%s3243_s4 + $0x8] sm:$0xff] %vm414_vm2, %v2089_v15 }
 0x1c4   :  { %v294_v36 = vpop.f32.mrf.mxu0  ;;  %v335_v38 = vpop.f32.mrf.mxu1  ;;  %420 = vst.msk [vmem:[%s3243_s4 + $0x148] sm:$0xff] %vm414_vm2, %v2091_v16 }
 0x1c5   :  { %v341_v39 = vsub.f32 %v294_v36, %v2093_v27  ;;  %v345_v40 = vsub.f32 %v335_v38, %v2095_v29  ;;  %v392_v41 = vsub.f32 %v384_v30, %v2053_v37  ;;  %v396_v42 = vsub.f32 %v388_v31, %v2053_v37 }
 0x1c6   :  { %v376_v45 = vmax.f32 %v368_v34, 0.0  ;;  %v380_v46 = vmax.f32 %v372_v35, 0.0 }
 0x1c7   :  { %v351_v43 = vmul.f32 %v2043_v28, %v341_v39  ;;  %v355_v44 = vmul.f32 %v2043_v28, %v345_v40  ;;  %v400_v47 = vmax.f32 %v392_v41, 0.0  ;;  %v404_v48 = vmax.f32 %v396_v42, 0.0 }
 0x1c9   :  { %v359_v49 = vsub.f32 0.0, %v351_v43  ;;  %v363_v50 = vsub.f32 0.0, %v355_v44  ;;  %v2115_v51 = vsub.f32 %v376_v45, %v400_v47  ;;  %v2117_v52 = vsub.f32 %v380_v46, %v404_v48 }
 0x1cb   :  { %v369_v53 = vsub.f32 %v359_v49, %v2053_v37  ;;  %v385_v54 = vsub.f32 0.0, %v359_v49  ;;  %v373_v57 = vsub.f32 %v363_v50, %v2053_v37  ;;  %v389_v58 = vsub.f32 0.0, %v363_v50  ;;  %417 = vst.msk [vmem:[%s3243_s4 + $0x10] sm:$0xff] %vm414_vm2, %v2115_v51 }
 0x1cc   :  { %421 = vst.msk [vmem:[%s3243_s4 + $0x150] sm:$0xff] %vm414_vm2, %v2117_v52 }
 0x1cd   :  { %v393_v28 = vsub.f32 %v385_v54, %v2053_v37  ;;  %v397_v61 = vsub.f32 %v389_v58, %v2053_v37  ;;  %v377_v62 = vmax.f32 %v369_v53, 0.0  ;;  %v381_v63 = vmax.f32 %v373_v57, 0.0 }
 0x1cf   :  { %v401_v0 = vmax.f32 %v393_v28, 0.0  ;;  %v405_v1 = vmax.f32 %v397_v61, 0.0 }
 0x1d1   :  { %v2133_v2 = vsub.f32 %v377_v62, %v401_v0  ;;  %v2135_v3 = vsub.f32 %v381_v63, %v405_v1 }
 0x1d3   :  { %418 = vst.msk [vmem:[%s3243_s4 + $0x18] sm:$0xff] %vm414_vm2, %v2133_v2  ;;  %435 = vmatpush.msrb.mxu2 %v2133_v2  ;;  %464 = vmatpush.msrb.mxu3 %v2135_v3 }
 0x1d4   :  { %422 = vst.msk [vmem:[%s3243_s4 + $0x158] sm:$0xff] %vm414_vm2, %v2135_v3 }
 0x1d5   :  { %436 = vmatpush.msrb.mxu2 %v2115_v51  ;;  %465 = vmatpush.msrb.mxu3 %v2117_v52 }
 0x1d7   :  { %437 = vmatpush.msrb.mxu2 %v2089_v15  ;;  %466 = vmatpush.msrb.mxu3 %v2091_v16 }
 0x1d9   :  { %438 = vmatpush.msrb.mxu2 %v2067_v59  ;;  %467 = vmatpush.msrb.mxu3 %v2069_v60 }
 0x1da   :  { %1740 = vmatmul.msk.f32.vlgmr.msrb.gmra.mxu2 %vm255_vm1, %v2007_v17  ;;  %1744 = vmatmul.msk.f32.vlgmr.msrb.gmra.mxu3 %vm255_vm1, %v2009_v18 }
 0x1e2   :  { %1741 = vmatmul.msk.f32.gmra.mxu2 %vm255_vm1, %v2015_v19  ;;  %1745 = vmatmul.msk.f32.gmra.mxu3 %vm255_vm1, %v2017_v20 }
 0x1ea   :  { %1742 = vmatmul.msk.f32.gmra.mxu2 %vm255_vm1, %v2023_v21  ;;  %1746 = vmatmul.msk.f32.gmra.mxu3 %vm255_vm1, %v2025_v22 }
 0x1f2   :  { %1743 = vmatmul.msk.f32.gmra.mxu2 %vm255_vm1, %v2031_v23  ;;  %1747 = vmatmul.msk.f32.gmra.mxu3 %vm255_vm1, %v2033_v24 }
 0x25d   :  { %v440_v37 = vpop.f32.mrf.mxu2  ;;  %v469_v5 = vpop.f32.mrf.mxu3 }
 0x25e   :  { %v481_v6 = vsub.f32 %v440_v37, %v2039_v25  ;;  %v485_v7 = vsub.f32 %v469_v5, %v2041_v26 }
 0x260   :  { %v491_v8 = vmul.f32 %v2171_v4, %v481_v6  ;;  %v495_v9 = vmul.f32 %v2171_v4, %v485_v7 }
 0x262   :  { %v499_v11 = vsub.f32 %v2067_v59, %v491_v8  ;;  %v503_v12 = vsub.f32 %v2069_v60, %v495_v9 }
 0x264   :  { %v525_v13 = vsub.f32 0.0, %v499_v11  ;;  %v529_v14 = vsub.f32 0.0, %v503_v12  ;;  %v509_v30 = vsub.f32 %v499_v11, %v2177_v10  ;;  %v513_v35 = vsub.f32 %v503_v12, %v2177_v10 }
 0x265   :  { %v443_v31 = vpop.f32.mrf.mxu2  ;;  %v472_v34 = vpop.f32.mrf.mxu3 }
 0x266   :  { %v482_v36 = vsub.f32 %v443_v31, %v2047_v32  ;;  %v486_v38 = vsub.f32 %v472_v34, %v2049_v33  ;;  %v533_v39 = vsub.f32 %v525_v13, %v2177_v10  ;;  %v537_v40 = vsub.f32 %v529_v14, %v2177_v10 }
 0x267   :  { %v517_v41 = vmax.f32 %v509_v30, 0.0  ;;  %v521_v43 = vmax.f32 %v513_v35, 0.0 }
 0x268   :  { %v492_v59 = vmul.f32 %v2171_v4, %v482_v36  ;;  %v496_v60 = vmul.f32 %v2171_v4, %v486_v38  ;;  %v541_v42 = vmax.f32 %v533_v39, 0.0  ;;  %v545_v44 = vmax.f32 %v537_v40, 0.0 }
 0x26a   :  { %v500_v45 = vsub.f32 %v2089_v15, %v492_v59  ;;  %v504_v46 = vsub.f32 %v2091_v16, %v496_v60  ;;  %v2191_v47 = vsub.f32 %v517_v41, %v541_v42  ;;  %v2193_v48 = vsub.f32 %v521_v43, %v545_v44 }
 0x26c   :  { %v526_v49 = vsub.f32 0.0, %v500_v45  ;;  %v530_v50 = vsub.f32 0.0, %v504_v46  ;;  %v510_v53 = vsub.f32 %v500_v45, %v2177_v10  ;;  %1750 = vst.msk [vmem:[%s3243_s4 + $0x20] sm:$0xff] %vm414_vm2, %v2191_v47  ;;  %v514_v15 = vsub.f32 %v504_v46, %v2177_v10 }
 0x26d   :  { %v446_v54 = vpop.f32.mrf.mxu2  ;;  %v475_v57 = vpop.f32.mrf.mxu3  ;;  %1754 = vst.msk [vmem:[%s3243_s4 + $0x160] sm:$0xff] %vm414_vm2, %v2193_v48 }
 0x26e   :  { %v483_v16 = vsub.f32 %v446_v54, %v2063_v55  ;;  %v487_v58 = vsub.f32 %v475_v57, %v2065_v56  ;;  %v534_v28 = vsub.f32 %v526_v49, %v2177_v10  ;;  %v538_v61 = vsub.f32 %v530_v50, %v2177_v10 }
 0x26f   :  { %v518_v0 = vmax.f32 %v510_v53, 0.0  ;;  %v522_v37 = vmax.f32 %v514_v15, 0.0 }
 0x270   :  { %v493_v62 = vmul.f32 %v2171_v4, %v483_v16  ;;  %v497_v63 = vmul.f32 %v2171_v4, %v487_v58  ;;  %v542_v1 = vmax.f32 %v534_v28, 0.0  ;;  %v546_v5 = vmax.f32 %v538_v61, 0.0 }
 0x271   :  { %v2295_v58 = vstv %s1766_s15  ;;  %s1856_s15 = sld [smem:[#allocation2 + $0x7]] }
 0x272   :  { %v501_v6 = vsub.f32 %v2115_v51, %v493_v62  ;;  %v505_v7 = vsub.f32 %v2117_v52, %v497_v63  ;;  %v2215_v8 = vsub.f32 %v518_v0, %v542_v1  ;;  %v2217_v9 = vsub.f32 %v522_v37, %v546_v5 }
 0x273   :  { %v2301_v1 = vstv %s1767_s16  ;;  %s1857_s16 = sld [smem:[#allocation4 + $0x7]] }
 0x274   :  { %v527_v11 = vsub.f32 0.0, %v501_v6  ;;  %v531_v12 = vsub.f32 0.0, %v505_v7  ;;  %v511_v13 = vsub.f32 %v501_v6, %v2177_v10  ;;  %1751 = vst.msk [vmem:[%s3243_s4 + $0x28] sm:$0xff] %vm414_vm2, %v2215_v8  ;;  %v515_v51 = vsub.f32 %v505_v7, %v2177_v10 }
 0x275   :  { %v449_v14 = vpop.f32.mrf.mxu2  ;;  %v478_v30 = vpop.f32.mrf.mxu3  ;;  %1755 = vst.msk [vmem:[%s3243_s4 + $0x168] sm:$0xff] %vm414_vm2, %v2217_v9 }
 0x276   :  { %v484_v52 = vsub.f32 %v449_v14, %v2093_v27  ;;  %v488_v31 = vsub.f32 %v478_v30, %v2095_v29  ;;  %v535_v34 = vsub.f32 %v527_v11, %v2177_v10  ;;  %v539_v35 = vsub.f32 %v531_v12, %v2177_v10 }
 0x277   :  { %v519_v39 = vmax.f32 %v511_v13, 0.0  ;;  %v523_v59 = vmax.f32 %v515_v51, 0.0 }
 0x278   :  { %v494_v36 = vmul.f32 %v2171_v4, %v484_v52  ;;  %v498_v38 = vmul.f32 %v2171_v4, %v488_v31  ;;  %v543_v40 = vmax.f32 %v535_v34, 0.0  ;;  %v547_v60 = vmax.f32 %v539_v35, 0.0 }
 0x27a   :  { %v502_v41 = vsub.f32 %v2133_v2, %v494_v36  ;;  %v506_v42 = vsub.f32 %v2135_v3, %v498_v38  ;;  %v2239_v43 = vsub.f32 %v519_v39, %v543_v40  ;;  %v2241_v44 = vsub.f32 %v523_v59, %v547_v60 }
 0x27c   :  { %v512_v45 = vsub.f32 %v502_v41, %v2177_v10  ;;  %v528_v46 = vsub.f32 0.0, %v502_v41  ;;  %v516_v49 = vsub.f32 %v506_v42, %v2177_v10  ;;  %v532_v50 = vsub.f32 0.0, %v506_v42  ;;  %1752 = vst.msk [vmem:[%s3243_s4 + $0x30] sm:$0xff] %vm414_vm2, %v2239_v43 }
 0x27d   :  { %1756 = vst.msk [vmem:[%s3243_s4 + $0x170] sm:$0xff] %vm414_vm2, %v2241_v44 }
 0x27e   :  { %v536_v2 = vsub.f32 %v528_v46, %v2177_v10  ;;  %v540_v3 = vsub.f32 %v532_v50, %v2177_v10  ;;  %v520_v4 = vmax.f32 %v512_v45, 0.0  ;;  %v524_v54 = vmax.f32 %v516_v49, 0.0 }
 0x280   :  { %v544_v53 = vmax.f32 %v536_v2, 0.0  ;;  %v548_v57 = vmax.f32 %v540_v3, 0.0 }
 0x282   :  { %v2257_v15 = vsub.f32 %v520_v4, %v544_v53  ;;  %v2259_v16 = vsub.f32 %v524_v54, %v548_v57 }
 0x284   :  { %1753 = vst.msk [vmem:[%s3243_s4 + $0x38] sm:$0xff] %vm414_vm2, %v2257_v15  ;;  %578 = vmatpush.msra.mxu0 %v2257_v15  ;;  %607 = vmatpush.msra.mxu1 %v2259_v16 }
 0x285   :  { %1757 = vst.msk [vmem:[%s3243_s4 + $0x178] sm:$0xff] %vm414_vm2, %v2259_v16 }
 0x286   :  { %579 = vmatpush.msra.mxu0 %v2239_v43  ;;  %608 = vmatpush.msra.mxu1 %v2241_v44 }
 0x288   :  { %580 = vmatpush.msra.mxu0 %v2215_v8  ;;  %609 = vmatpush.msra.mxu1 %v2217_v9 }
 0x28a   :  { %581 = vmatpush.msra.mxu0 %v2191_v47  ;;  %610 = vmatpush.msra.mxu1 %v2193_v48 }
 0x28b   :  { %1758 = vmatmul.msk.f32.vlgmr.msra.gmra.mxu0 %vm255_vm1, %v2007_v17  ;;  %1762 = vmatmul.msk.f32.vlgmr.msra.gmra.mxu1 %vm255_vm1, %v2009_v18 }
 0x293   :  { %1759 = vmatmul.msk.f32.gmra.mxu0 %vm255_vm1, %v2015_v19  ;;  %1763 = vmatmul.msk.f32.gmra.mxu1 %vm255_vm1, %v2017_v20 }
 0x29b   :  { %1760 = vmatmul.msk.f32.gmra.mxu0 %vm255_vm1, %v2023_v21  ;;  %1764 = vmatmul.msk.f32.gmra.mxu1 %vm255_vm1, %v2025_v22 }
 0x2a3   :  { %1761 = vmatmul.msk.f32.gmra.mxu0 %vm255_vm1, %v2031_v23  ;;  %1765 = vmatmul.msk.f32.gmra.mxu1 %vm255_vm1, %v2033_v24 }
 0x308   :  { %v583_v10 = vpop.f32.mrf.mxu0  ;;  %v612_v28 = vpop.f32.mrf.mxu1 }
 0x309   :  { %v624_v61 = vsub.f32 %v583_v10, %v2039_v25  ;;  %v628_v62 = vsub.f32 %v612_v28, %v2041_v26 }
 0x30b   :  { %v634_v63 = vmul.f32 %v2295_v58, %v624_v61  ;;  %v638_v0 = vmul.f32 %v2295_v58, %v628_v62 }
 0x30d   :  { %v642_v37 = vsub.f32 %v2191_v47, %v634_v63  ;;  %v646_v5 = vsub.f32 %v2193_v48, %v638_v0 }
 0x30f   :  { %v668_v6 = vsub.f32 0.0, %v642_v37  ;;  %v672_v7 = vsub.f32 0.0, %v646_v5  ;;  %v652_v11 = vsub.f32 %v642_v37, %v2301_v1  ;;  %v656_v14 = vsub.f32 %v646_v5, %v2301_v1 }
 0x310   :  { %v586_v12 = vpop.f32.mrf.mxu0  ;;  %v615_v13 = vpop.f32.mrf.mxu1 }
 0x311   :  { %v625_v30 = vsub.f32 %v586_v12, %v2047_v32  ;;  %v629_v51 = vsub.f32 %v615_v13, %v2049_v33  ;;  %v676_v52 = vsub.f32 %v668_v6, %v2301_v1  ;;  %v680_v31 = vsub.f32 %v672_v7, %v2301_v1 }
 0x312   :  { %v660_v34 = vmax.f32 %v652_v11, 0.0  ;;  %v664_v36 = vmax.f32 %v656_v14, 0.0 }
 0x313   :  { %v635_v47 = vmul.f32 %v2295_v58, %v625_v30  ;;  %v639_v48 = vmul.f32 %v2295_v58, %v629_v51  ;;  %v684_v35 = vmax.f32 %v676_v52, 0.0  ;;  %v688_v38 = vmax.f32 %v680_v31, 0.0 }
 0x315   :  { %v643_v39 = vsub.f32 %v2215_v8, %v635_v47  ;;  %v647_v40 = vsub.f32 %v2217_v9, %v639_v48  ;;  %v2315_v59 = vsub.f32 %v660_v34, %v684_v35  ;;  %v2317_v60 = vsub.f32 %v664_v36, %v688_v38 }
 0x317   :  { %v669_v41 = vsub.f32 0.0, %v643_v39  ;;  %v673_v42 = vsub.f32 0.0, %v647_v40  ;;  %v653_v45 = vsub.f32 %v643_v39, %v2301_v1  ;;  %1768 = vst.msk [vmem:[%s3243_s4 + $0x40] sm:$0xff] %vm414_vm2, %v2315_v59  ;;  %v657_v8 = vsub.f32 %v647_v40, %v2301_v1 }
 0x318   :  { %v589_v46 = vpop.f32.mrf.mxu0  ;;  %v618_v49 = vpop.f32.mrf.mxu1  ;;  %1772 = vst.msk [vmem:[%s3243_s4 + $0x180] sm:$0xff] %vm414_vm2, %v2317_v60 }
 0x319   :  { %v626_v9 = vsub.f32 %v589_v46, %v2063_v55  ;;  %v630_v50 = vsub.f32 %v618_v49, %v2065_v56  ;;  %v677_v2 = vsub.f32 %v669_v41, %v2301_v1  ;;  %v681_v3 = vsub.f32 %v673_v42, %v2301_v1 }
 0x31a   :  { %v661_v54 = vmax.f32 %v653_v45, 0.0  ;;  %v665_v10 = vmax.f32 %v657_v8, 0.0 }
 0x31b   :  { %v636_v4 = vmul.f32 %v2295_v58, %v626_v9  ;;  %v640_v53 = vmul.f32 %v2295_v58, %v630_v50  ;;  %v685_v57 = vmax.f32 %v677_v2, 0.0  ;;  %v689_v28 = vmax.f32 %v681_v3, 0.0 }
 0x31c   :  { %v2419_v50 = vstv %s1784_s5  ;;  %s1874_s5 = sld [smem:[#allocation2 + $0x8]] }
 0x31d   :  { %v644_v61 = vsub.f32 %v2239_v43, %v636_v4  ;;  %v648_v62 = vsub.f32 %v2241_v44, %v640_v53  ;;  %v2339_v63 = vsub.f32 %v661_v54, %v685_v57  ;;  %v2341_v0 = vsub.f32 %v665_v10, %v689_v28 }
 0x31e   :  { %v2425_v57 = vstv %s1785_s6  ;;  %s1875_s6 = sld [smem:[#allocation4 + $0x8]] }
 0x31f   :  { %v670_v37 = vsub.f32 0.0, %v644_v61  ;;  %v674_v5 = vsub.f32 0.0, %v648_v62  ;;  %v654_v6 = vsub.f32 %v644_v61, %v2301_v1  ;;  %1769 = vst.msk [vmem:[%s3243_s4 + $0x48] sm:$0xff] %vm414_vm2, %v2339_v63  ;;  %v658_v43 = vsub.f32 %v648_v62, %v2301_v1 }
 0x320   :  { %v592_v7 = vpop.f32.mrf.mxu0  ;;  %v621_v11 = vpop.f32.mrf.mxu1  ;;  %1773 = vst.msk [vmem:[%s3243_s4 + $0x188] sm:$0xff] %vm414_vm2, %v2341_v0 }
 0x321   :  { %v627_v44 = vsub.f32 %v592_v7, %v2093_v27  ;;  %v631_v12 = vsub.f32 %v621_v11, %v2095_v29  ;;  %v678_v13 = vsub.f32 %v670_v37, %v2301_v1  ;;  %v682_v14 = vsub.f32 %v674_v5, %v2301_v1 }
 0x322   :  { %v662_v52 = vmax.f32 %v654_v6, 0.0  ;;  %v666_v47 = vmax.f32 %v658_v43, 0.0 }
 0x323   :  { %v637_v30 = vmul.f32 %v2295_v58, %v627_v44  ;;  %v641_v51 = vmul.f32 %v2295_v58, %v631_v12  ;;  %v686_v31 = vmax.f32 %v678_v13, 0.0  ;;  %v690_v48 = vmax.f32 %v682_v14, 0.0 }
 0x325   :  { %v645_v34 = vsub.f32 %v2257_v15, %v637_v30  ;;  %v649_v35 = vsub.f32 %v2259_v16, %v641_v51  ;;  %v2363_v36 = vsub.f32 %v662_v52, %v686_v31  ;;  %v2365_v38 = vsub.f32 %v666_v47, %v690_v48 }
 0x327   :  { %v655_v39 = vsub.f32 %v645_v34, %v2301_v1  ;;  %v671_v40 = vsub.f32 0.0, %v645_v34  ;;  %v659_v41 = vsub.f32 %v649_v35, %v2301_v1  ;;  %v675_v42 = vsub.f32 0.0, %v649_v35  ;;  %1770 = vst.msk [vmem:[%s3243_s4 + $0x50] sm:$0xff] %vm414_vm2, %v2363_v36 }
 0x328   :  { %1774 = vst.msk [vmem:[%s3243_s4 + $0x190] sm:$0xff] %vm414_vm2, %v2365_v38 }
 0x329   :  { %v679_v15 = vsub.f32 %v671_v40, %v2301_v1  ;;  %v683_v16 = vsub.f32 %v675_v42, %v2301_v1  ;;  %v663_v58 = vmax.f32 %v655_v39, 0.0  ;;  %v667_v46 = vmax.f32 %v659_v41, 0.0 }
 0x32b   :  { %v687_v45 = vmax.f32 %v679_v15, 0.0  ;;  %v691_v49 = vmax.f32 %v683_v16, 0.0 }
 0x32d   :  { %v2381_v8 = vsub.f32 %v663_v58, %v687_v45  ;;  %v2383_v9 = vsub.f32 %v667_v46, %v691_v49 }
 0x32f   :  { %1771 = vst.msk [vmem:[%s3243_s4 + $0x58] sm:$0xff] %vm414_vm2, %v2381_v8  ;;  %721 = vmatpush.msra.mxu2 %v2381_v8  ;;  %750 = vmatpush.msra.mxu3 %v2383_v9 }
 0x330   :  { %1775 = vst.msk [vmem:[%s3243_s4 + $0x198] sm:$0xff] %vm414_vm2, %v2383_v9 }
 0x331   :  { %722 = vmatpush.msra.mxu2 %v2363_v36  ;;  %751 = vmatpush.msra.mxu3 %v2365_v38 }
 0x333   :  { %723 = vmatpush.msra.mxu2 %v2339_v63  ;;  %752 = vmatpush.msra.mxu3 %v2341_v0 }
 0x335   :  { %724 = vmatpush.msra.mxu2 %v2315_v59  ;;  %753 = vmatpush.msra.mxu3 %v2317_v60 }
 0x336   :  { %1776 = vmatmul.msk.f32.vlgmr.msra.gmra.mxu2 %vm255_vm1, %v2007_v17  ;;  %1780 = vmatmul.msk.f32.vlgmr.msra.gmra.mxu3 %vm255_vm1, %v2009_v18 }
 0x33e   :  { %1777 = vmatmul.msk.f32.gmra.mxu2 %vm255_vm1, %v2015_v19  ;;  %1781 = vmatmul.msk.f32.gmra.mxu3 %vm255_vm1, %v2017_v20 }
 0x346   :  { %1778 = vmatmul.msk.f32.gmra.mxu2 %vm255_vm1, %v2023_v21  ;;  %1782 = vmatmul.msk.f32.gmra.mxu3 %vm255_vm1, %v2025_v22 }
 0x34e   :  { %1779 = vmatmul.msk.f32.gmra.mxu2 %vm255_vm1, %v2031_v23  ;;  %1783 = vmatmul.msk.f32.gmra.mxu3 %vm255_vm1, %v2033_v24 }
 0x3b9   :  { %v726_v1 = vpop.f32.mrf.mxu2  ;;  %v755_v2 = vpop.f32.mrf.mxu3 }
 0x3ba   :  { %v767_v3 = vsub.f32 %v726_v1, %v2039_v25  ;;  %v771_v4 = vsub.f32 %v755_v2, %v2041_v26 }
 0x3bc   :  { %v777_v53 = vmul.f32 %v2419_v50, %v767_v3  ;;  %v781_v54 = vmul.f32 %v2419_v50, %v771_v4 }
 0x3be   :  { %v785_v10 = vsub.f32 %v2315_v59, %v777_v53  ;;  %v789_v28 = vsub.f32 %v2317_v60, %v781_v54 }
 0x3c0   :  { %v811_v61 = vsub.f32 0.0, %v785_v10  ;;  %v815_v62 = vsub.f32 0.0, %v789_v28  ;;  %v795_v37 = vsub.f32 %v785_v10, %v2425_v57  ;;  %v799_v7 = vsub.f32 %v789_v28, %v2425_v57 }
 0x3c1   :  { %v729_v5 = vpop.f32.mrf.mxu2  ;;  %v758_v6 = vpop.f32.mrf.mxu3 }
 0x3c2   :  { %v768_v11 = vsub.f32 %v729_v5, %v2047_v32  ;;  %v772_v43 = vsub.f32 %v758_v6, %v2049_v33  ;;  %v819_v44 = vsub.f32 %v811_v61, %v2425_v57  ;;  %v823_v12 = vsub.f32 %v815_v62, %v2425_v57 }
 0x3c3   :  { %v803_v13 = vmax.f32 %v795_v37, 0.0  ;;  %v807_v30 = vmax.f32 %v799_v7, 0.0 }
 0x3c4   :  { %v778_v59 = vmul.f32 %v2419_v50, %v768_v11  ;;  %v782_v60 = vmul.f32 %v2419_v50, %v772_v43  ;;  %v827_v14 = vmax.f32 %v819_v44, 0.0  ;;  %v831_v51 = vmax.f32 %v823_v12, 0.0 }
 0x3c6   :  { %v786_v52 = vsub.f32 %v2339_v63, %v778_v59  ;;  %v790_v31 = vsub.f32 %v2341_v0, %v782_v60  ;;  %v2439_v47 = vsub.f32 %v803_v13, %v827_v14  ;;  %v2441_v48 = vsub.f32 %v807_v30, %v831_v51 }
 0x3c8   :  { %v812_v34 = vsub.f32 0.0, %v786_v52  ;;  %v816_v35 = vsub.f32 0.0, %v790_v31  ;;  %v796_v39 = vsub.f32 %v786_v52, %v2425_v57  ;;  %1786 = vst.msk [vmem:[%s3243_s4 + $0x60] sm:$0xff] %vm414_vm2, %v2439_v47  ;;  %v800_v63 = vsub.f32 %v790_v31, %v2425_v57 }
 0x3c9   :  { %v732_v40 = vpop.f32.mrf.mxu2  ;;  %v761_v41 = vpop.f32.mrf.mxu3  ;;  %1790 = vst.msk [vmem:[%s3243_s4 + $0x1a0] sm:$0xff] %vm414_vm2, %v2441_v48 }
 0x3ca   :  { %v769_v0 = vsub.f32 %v732_v40, %v2063_v55  ;;  %v773_v42 = vsub.f32 %v761_v41, %v2065_v56  ;;  %v820_v15 = vsub.f32 %v812_v34, %v2425_v57  ;;  %v824_v16 = vsub.f32 %v816_v35, %v2425_v57 }
 0x3cb   :  { %v804_v46 = vmax.f32 %v796_v39, 0.0  ;;  %v808_v1 = vmax.f32 %v800_v63, 0.0 }
 0x3cc   :  { %v779_v58 = vmul.f32 %v2419_v50, %v769_v0  ;;  %v783_v45 = vmul.f32 %v2419_v50, %v773_v42  ;;  %v828_v49 = vmax.f32 %v820_v15, 0.0  ;;  %v832_v2 = vmax.f32 %v824_v16, 0.0 }
 0x3cd   :  { %v2543_v42 = vstv %s1802_s21  ;;  %s1892_s21 = sld [smem:[#allocation2 + $0x9]] }
 0x3ce   :  { %v787_v3 = vsub.f32 %v2363_v36, %v779_v58  ;;  %v791_v4 = vsub.f32 %v2365_v38, %v783_v45  ;;  %v2463_v53 = vsub.f32 %v804_v46, %v828_v49  ;;  %v2465_v54 = vsub.f32 %v808_v1, %v832_v2 }
 0x3cf   :  { %v2549_v49 = vstv %s1803_s22  ;;  %s1893_s22 = sld [smem:[#allocation4 + $0x9]] }
 0x3d0   :  { %v813_v10 = vsub.f32 0.0, %v787_v3  ;;  %v817_v28 = vsub.f32 0.0, %v791_v4  ;;  %v797_v61 = vsub.f32 %v787_v3, %v2425_v57  ;;  %1787 = vst.msk [vmem:[%s3243_s4 + $0x68] sm:$0xff] %vm414_vm2, %v2463_v53  ;;  %v801_v36 = vsub.f32 %v791_v4, %v2425_v57 }
 0x3d1   :  { %v735_v62 = vpop.f32.mrf.mxu2  ;;  %v764_v37 = vpop.f32.mrf.mxu3  ;;  %1791 = vst.msk [vmem:[%s3243_s4 + $0x1a8] sm:$0xff] %vm414_vm2, %v2465_v54 }
 0x3d2   :  { %v770_v38 = vsub.f32 %v735_v62, %v2093_v27  ;;  %v774_v5 = vsub.f32 %v764_v37, %v2095_v29  ;;  %v821_v6 = vsub.f32 %v813_v10, %v2425_v57  ;;  %v825_v7 = vsub.f32 %v817_v28, %v2425_v57 }
 0x3d3   :  { %v805_v44 = vmax.f32 %v797_v61, 0.0  ;;  %v809_v59 = vmax.f32 %v801_v36, 0.0 }
 0x3d4   :  { %v780_v11 = vmul.f32 %v2419_v50, %v770_v38  ;;  %v784_v43 = vmul.f32 %v2419_v50, %v774_v5  ;;  %v829_v12 = vmax.f32 %v821_v6, 0.0  ;;  %v833_v60 = vmax.f32 %v825_v7, 0.0 }
 0x3d6   :  { %v788_v13 = vsub.f32 %v2381_v8, %v780_v11  ;;  %v792_v14 = vsub.f32 %v2383_v9, %v784_v43  ;;  %v2487_v30 = vsub.f32 %v805_v44, %v829_v12  ;;  %v2489_v51 = vsub.f32 %v809_v59, %v833_v60 }
 0x3d8   :  { %v798_v52 = vsub.f32 %v788_v13, %v2425_v57  ;;  %v814_v31 = vsub.f32 0.0, %v788_v13  ;;  %v802_v34 = vsub.f32 %v792_v14, %v2425_v57  ;;  %v818_v35 = vsub.f32 0.0, %v792_v14  ;;  %1788 = vst.msk [vmem:[%s3243_s4 + $0x70] sm:$0xff] %vm414_vm2, %v2487_v30 }
 0x3d9   :  { %1792 = vst.msk [vmem:[%s3243_s4 + $0x1b0] sm:$0xff] %vm414_vm2, %v2489_v51 }
 0x3da   :  { %v822_v8 = vsub.f32 %v814_v31, %v2425_v57  ;;  %v826_v9 = vsub.f32 %v818_v35, %v2425_v57  ;;  %v806_v50 = vmax.f32 %v798_v52, 0.0  ;;  %v810_v40 = vmax.f32 %v802_v34, 0.0 }
 0x3dc   :  { %v830_v39 = vmax.f32 %v822_v8, 0.0  ;;  %v834_v41 = vmax.f32 %v826_v9, 0.0 }
 0x3de   :  { %v2505_v63 = vsub.f32 %v806_v50, %v830_v39  ;;  %v2507_v0 = vsub.f32 %v810_v40, %v834_v41 }
 0x3e0   :  { %1789 = vst.msk [vmem:[%s3243_s4 + $0x78] sm:$0xff] %vm414_vm2, %v2505_v63  ;;  %864 = vmatpush.msrb.mxu0 %v2505_v63  ;;  %893 = vmatpush.msrb.mxu1 %v2507_v0 }
 0x3e1   :  { %1793 = vst.msk [vmem:[%s3243_s4 + $0x1b8] sm:$0xff] %vm414_vm2, %v2507_v0 }
 0x3e2   :  { %865 = vmatpush.msrb.mxu0 %v2487_v30  ;;  %894 = vmatpush.msrb.mxu1 %v2489_v51 }
 0x3e4   :  { %866 = vmatpush.msrb.mxu0 %v2463_v53  ;;  %895 = vmatpush.msrb.mxu1 %v2465_v54 }
 0x3e6   :  { %867 = vmatpush.msrb.mxu0 %v2439_v47  ;;  %896 = vmatpush.msrb.mxu1 %v2441_v48 }
 0x3e7   :  { %1794 = vmatmul.msk.f32.vlgmr.msrb.gmra.mxu0 %vm255_vm1, %v2007_v17  ;;  %1798 = vmatmul.msk.f32.vlgmr.msrb.gmra.mxu1 %vm255_vm1, %v2009_v18 }
 0x3ef   :  { %1795 = vmatmul.msk.f32.gmra.mxu0 %vm255_vm1, %v2015_v19  ;;  %1799 = vmatmul.msk.f32.gmra.mxu1 %vm255_vm1, %v2017_v20 }
 0x3f7   :  { %1796 = vmatmul.msk.f32.gmra.mxu0 %vm255_vm1, %v2023_v21  ;;  %1800 = vmatmul.msk.f32.gmra.mxu1 %vm255_vm1, %v2025_v22 }
 0x3ff   :  { %1797 = vmatmul.msk.f32.gmra.mxu0 %vm255_vm1, %v2031_v23  ;;  %1801 = vmatmul.msk.f32.gmra.mxu1 %vm255_vm1, %v2033_v24 }
 0x464   :  { %v869_v57 = vpop.f32.mrf.mxu0  ;;  %v898_v15 = vpop.f32.mrf.mxu1 }
 0x465   :  { %v910_v16 = vsub.f32 %v869_v57, %v2039_v25  ;;  %v914_v58 = vsub.f32 %v898_v15, %v2041_v26 }
 0x467   :  { %v920_v45 = vmul.f32 %v2543_v42, %v910_v16  ;;  %v924_v46 = vmul.f32 %v2543_v42, %v914_v58 }
 0x469   :  { %v928_v1 = vsub.f32 %v2439_v47, %v920_v45  ;;  %v932_v2 = vsub.f32 %v2441_v48, %v924_v46 }
 0x46b   :  { %v954_v3 = vsub.f32 0.0, %v928_v1  ;;  %v958_v4 = vsub.f32 0.0, %v932_v2  ;;  %v938_v10 = vsub.f32 %v928_v1, %v2549_v49  ;;  %v942_v62 = vsub.f32 %v932_v2, %v2549_v49 }
 0x46c   :  { %v872_v28 = vpop.f32.mrf.mxu0  ;;  %v901_v61 = vpop.f32.mrf.mxu1 }
 0x46d   :  { %v911_v37 = vsub.f32 %v872_v28, %v2047_v32  ;;  %v915_v36 = vsub.f32 %v901_v61, %v2049_v33  ;;  %v962_v38 = vsub.f32 %v954_v3, %v2549_v49  ;;  %v966_v5 = vsub.f32 %v958_v4, %v2549_v49 }
 0x46e   :  { %v946_v6 = vmax.f32 %v938_v10, 0.0  ;;  %v950_v11 = vmax.f32 %v942_v62, 0.0 }
 0x46f   :  { %v921_v47 = vmul.f32 %v2543_v42, %v911_v37  ;;  %v925_v48 = vmul.f32 %v2543_v42, %v915_v36  ;;  %v970_v7 = vmax.f32 %v962_v38, 0.0  ;;  %v974_v43 = vmax.f32 %v966_v5, 0.0 }
 0x471   :  { %v929_v44 = vsub.f32 %v2463_v53, %v921_v47  ;;  %v933_v12 = vsub.f32 %v2465_v54, %v925_v48  ;;  %v2563_v59 = vsub.f32 %v946_v6, %v970_v7  ;;  %v2565_v60 = vsub.f32 %v950_v11, %v974_v43 }
 0x473   :  { %v955_v13 = vsub.f32 0.0, %v929_v44  ;;  %v959_v14 = vsub.f32 0.0, %v933_v12  ;;  %v939_v52 = vsub.f32 %v929_v44, %v2549_v49  ;;  %1804 = vst.msk [vmem:[%s3243_s4 + $0x80] sm:$0xff] %vm414_vm2, %v2563_v59  ;;  %v943_v53 = vsub.f32 %v933_v12, %v2549_v49 }
 0x474   :  { %v875_v31 = vpop.f32.mrf.mxu0  ;;  %v904_v34 = vpop.f32.mrf.mxu1  ;;  %1808 = vst.msk [vmem:[%s3243_s4 + $0x1c0] sm:$0xff] %vm414_vm2, %v2565_v60 }
 0x475   :  { %v912_v54 = vsub.f32 %v875_v31, %v2063_v55  ;;  %v916_v35 = vsub.f32 %v904_v34, %v2065_v56  ;;  %v963_v8 = vsub.f32 %v955_v13, %v2549_v49  ;;  %v967_v9 = vsub.f32 %v959_v14, %v2549_v49 }
 0x476   :  { %v947_v40 = vmax.f32 %v939_v52, 0.0  ;;  %v951_v57 = vmax.f32 %v943_v53, 0.0 }
 0x477   :  { %v922_v50 = vmul.f32 %v2543_v42, %v912_v54  ;;  %v926_v39 = vmul.f32 %v2543_v42, %v916_v35  ;;  %v971_v41 = vmax.f32 %v963_v8, 0.0  ;;  %v975_v15 = vmax.f32 %v967_v9, 0.0 }
 0x478   :  { %v2667_v35 = vstv %s1820_s2 }
 0x479   :  { %v930_v16 = vsub.f32 %v2487_v30, %v922_v50  ;;  %v934_v58 = vsub.f32 %v2489_v51, %v926_v39  ;;  %v2587_v45 = vsub.f32 %v947_v40, %v971_v41  ;;  %v2589_v46 = vsub.f32 %v951_v57, %v975_v15 }
 0x47a   :  { %v2673_v41 = vstv %s1821_s3 }
 0x47b   :  { %v956_v1 = vsub.f32 0.0, %v930_v16  ;;  %v960_v2 = vsub.f32 0.0, %v934_v58  ;;  %v940_v3 = vsub.f32 %v930_v16, %v2549_v49  ;;  %1805 = vst.msk [vmem:[%s3243_s4 + $0x88] sm:$0xff] %vm414_vm2, %v2587_v45  ;;  %v944_v30 = vsub.f32 %v934_v58, %v2549_v49 }
 0x47c   :  { %v878_v4 = vpop.f32.mrf.mxu0  ;;  %v907_v10 = vpop.f32.mrf.mxu1  ;;  %1809 = vst.msk [vmem:[%s3243_s4 + $0x1c8] sm:$0xff] %vm414_vm2, %v2589_v46 }
 0x47d   :  { %v913_v51 = vsub.f32 %v878_v4, %v2093_v27  ;;  %v917_v28 = vsub.f32 %v907_v10, %v2095_v29  ;;  %v964_v61 = vsub.f32 %v956_v1, %v2549_v49  ;;  %v968_v62 = vsub.f32 %v960_v2, %v2549_v49 }
 0x47e   :  { %v948_v38 = vmax.f32 %v940_v3, 0.0  ;;  %v952_v47 = vmax.f32 %v944_v30, 0.0 }
 0x47f   :  { %v923_v37 = vmul.f32 %v2543_v42, %v913_v51  ;;  %v927_v36 = vmul.f32 %v2543_v42, %v917_v28  ;;  %v972_v5 = vmax.f32 %v964_v61, 0.0  ;;  %v976_v48 = vmax.f32 %v968_v62, 0.0 }
 0x481   :  { %v931_v6 = vsub.f32 %v2505_v63, %v923_v37  ;;  %v935_v7 = vsub.f32 %v2507_v0, %v927_v36  ;;  %v2611_v11 = vsub.f32 %v948_v38, %v972_v5  ;;  %v2613_v43 = vsub.f32 %v952_v47, %v976_v48 }
 0x483   :  { %v941_v44 = vsub.f32 %v931_v6, %v2549_v49  ;;  %v957_v12 = vsub.f32 0.0, %v931_v6  ;;  %v945_v13 = vsub.f32 %v935_v7, %v2549_v49  ;;  %v961_v14 = vsub.f32 0.0, %v935_v7  ;;  %1806 = vst.msk [vmem:[%s3243_s4 + $0x90] sm:$0xff] %vm414_vm2, %v2611_v11 }
 0x484   :  { %1810 = vst.msk [vmem:[%s3243_s4 + $0x1d0] sm:$0xff] %vm414_vm2, %v2613_v43 }
 0x485   :  { %v965_v63 = vsub.f32 %v957_v12, %v2549_v49  ;;  %v969_v0 = vsub.f32 %v961_v14, %v2549_v49  ;;  %v949_v42 = vmax.f32 %v941_v44, 0.0  ;;  %v953_v31 = vmax.f32 %v945_v13, 0.0 }
 0x487   :  { %v973_v52 = vmax.f32 %v965_v63, 0.0  ;;  %v977_v34 = vmax.f32 %v969_v0, 0.0 }
 0x489   :  { %v2629_v53 = vsub.f32 %v949_v42, %v973_v52  ;;  %v2631_v54 = vsub.f32 %v953_v31, %v977_v34 }
 0x48b   :  { %1807 = vst.msk [vmem:[%s3243_s4 + $0x98] sm:$0xff] %vm414_vm2, %v2629_v53  ;;  %1007 = vmatpush.msrb.mxu2 %v2629_v53  ;;  %1036 = vmatpush.msrb.mxu3 %v2631_v54 }
 0x48c   :  { %1811 = vst.msk [vmem:[%s3243_s4 + $0x1d8] sm:$0xff] %vm414_vm2, %v2631_v54 }
 0x48d   :  { %1008 = vmatpush.msrb.mxu2 %v2611_v11  ;;  %1037 = vmatpush.msrb.mxu3 %v2613_v43 }
 0x48f   :  { %1009 = vmatpush.msrb.mxu2 %v2587_v45  ;;  %1038 = vmatpush.msrb.mxu3 %v2589_v46 }
 0x491   :  { %1010 = vmatpush.msrb.mxu2 %v2563_v59  ;;  %1039 = vmatpush.msrb.mxu3 %v2565_v60 }
 0x492   :  { %1812 = vmatmul.msk.f32.vlgmr.msrb.gmra.mxu2 %vm255_vm1, %v2007_v17  ;;  %1816 = vmatmul.msk.f32.vlgmr.msrb.gmra.mxu3 %vm255_vm1, %v2009_v18 }
 0x49a   :  { %1813 = vmatmul.msk.f32.gmra.mxu2 %vm255_vm1, %v2015_v19  ;;  %1817 = vmatmul.msk.f32.gmra.mxu3 %vm255_vm1, %v2017_v20 }
 0x4a2   :  { %1814 = vmatmul.msk.f32.gmra.mxu2 %vm255_vm1, %v2023_v21  ;;  %1818 = vmatmul.msk.f32.gmra.mxu3 %vm255_vm1, %v2025_v22 }
 0x4aa   :  { %1815 = vmatmul.msk.f32.gmra.mxu2 %vm255_vm1, %v2031_v23  ;;  %1819 = vmatmul.msk.f32.gmra.mxu3 %vm255_vm1, %v2033_v24 }
 0x515   :  { %v1012_v49 = vpop.f32.mrf.mxu2  ;;  %v1041_v8 = vpop.f32.mrf.mxu3 }
 0x516   :  { %v1053_v9 = vsub.f32 %v1012_v49, %v2039_v25  ;;  %v1057_v50 = vsub.f32 %v1041_v8, %v2041_v26 }
 0x518   :  { %v1063_v39 = vmul.f32 %v2667_v35, %v1053_v9  ;;  %v1067_v40 = vmul.f32 %v2667_v35, %v1057_v50 }
 0x51a   :  { %v1071_v57 = vsub.f32 %v2563_v59, %v1063_v39  ;;  %v1075_v15 = vsub.f32 %v2565_v60, %v1067_v40 }
 0x51c   :  { %v1097_v16 = vsub.f32 0.0, %v1071_v57  ;;  %v1101_v58 = vsub.f32 0.0, %v1075_v15  ;;  %v1081_v1 = vsub.f32 %v1071_v57, %v2673_v41  ;;  %v1085_v4 = vsub.f32 %v1075_v15, %v2673_v41 }
 0x51d   :  { %v1015_v2 = vpop.f32.mrf.mxu2  ;;  %v1044_v3 = vpop.f32.mrf.mxu3 }
 0x51e   :  { %v1054_v10 = vsub.f32 %v1015_v2, %v2047_v32  ;;  %v1058_v30 = vsub.f32 %v1044_v3, %v2049_v33  ;;  %v1105_v51 = vsub.f32 %v1097_v16, %v2673_v41  ;;  %v1109_v28 = vsub.f32 %v1101_v58, %v2673_v41 }
 0x51f   :  { %v1089_v61 = vmax.f32 %v1081_v1, 0.0  ;;  %v1093_v37 = vmax.f32 %v1085_v4, 0.0 }
 0x520   :  { %v1064_v59 = vmul.f32 %v2667_v35, %v1054_v10  ;;  %v1068_v60 = vmul.f32 %v2667_v35, %v1058_v30  ;;  %v1113_v62 = vmax.f32 %v1105_v51, 0.0  ;;  %v1117_v36 = vmax.f32 %v1109_v28, 0.0 }
 0x522   :  { %v1072_v38 = vsub.f32 %v2587_v45, %v1064_v59  ;;  %v1076_v5 = vsub.f32 %v2589_v46, %v1068_v60  ;;  %v2687_v47 = vsub.f32 %v1089_v61, %v1113_v62  ;;  %v2689_v48 = vsub.f32 %v1093_v37, %v1117_v36 }
 0x524   :  { %v1098_v6 = vsub.f32 0.0, %v1072_v38  ;;  %v1102_v7 = vsub.f32 0.0, %v1076_v5  ;;  %v1082_v44 = vsub.f32 %v1072_v38, %v2673_v41  ;;  %1822 = vst.msk [vmem:[%s3243_s4 + $0xa0] sm:$0xff] %vm414_vm2, %v2687_v47  ;;  %v1086_v45 = vsub.f32 %v1076_v5, %v2673_v41 }
 0x525   :  { %v1018_v12 = vpop.f32.mrf.mxu2  ;;  %v1047_v13 = vpop.f32.mrf.mxu3  ;;  %1826 = vst.msk [vmem:[%s3243_s4 + $0x1e0] sm:$0xff] %vm414_vm2, %v2689_v48 }
 0x526   :  { %v1055_v46 = vsub.f32 %v1018_v12, %v2063_v55  ;;  %v1059_v14 = vsub.f32 %v1047_v13, %v2065_v56  ;;  %v1106_v63 = vsub.f32 %v1098_v6, %v2673_v41  ;;  %v1110_v0 = vsub.f32 %v1102_v7, %v2673_v41 }
 0x527   :  { %v1090_v31 = vmax.f32 %v1082_v44, 0.0  ;;  %v1094_v49 = vmax.f32 %v1086_v45, 0.0 }
 0x528   :  { %v1065_v42 = vmul.f32 %v2667_v35, %v1055_v46  ;;  %v1069_v52 = vmul.f32 %v2667_v35, %v1059_v14  ;;  %v1114_v34 = vmax.f32 %v1106_v63, 0.0  ;;  %v1118_v8 = vmax.f32 %v1110_v0, 0.0 }
 0x529   :  { %v2791_v14 = vstv %s1838_s26 }
 0x52a   :  { %v1073_v9 = vsub.f32 %v2611_v11, %v1065_v42  ;;  %v1077_v50 = vsub.f32 %v2613_v43, %v1069_v52  ;;  %v2711_v39 = vsub.f32 %v1090_v31, %v1114_v34  ;;  %v2713_v40 = vsub.f32 %v1094_v49, %v1118_v8 }
 0x52b   :  { %v2797_v34 = vstv %s1839_s1 }
 0x52c   :  { %v1099_v57 = vsub.f32 0.0, %v1073_v9  ;;  %v1103_v15 = vsub.f32 0.0, %v1077_v50  ;;  %v1083_v16 = vsub.f32 %v1073_v9, %v2673_v41  ;;  %1823 = vst.msk [vmem:[%s3243_s4 + $0xa8] sm:$0xff] %vm414_vm2, %v2711_v39  ;;  %v1087_v11 = vsub.f32 %v1077_v50, %v2673_v41 }
 0x52d   :  { %v1021_v58 = vpop.f32.mrf.mxu2  ;;  %v1050_v1 = vpop.f32.mrf.mxu3  ;;  %1827 = vst.msk [vmem:[%s3243_s4 + $0x1e8] sm:$0xff] %vm414_vm2, %v2713_v40 }
 0x52e   :  { %v1056_v43 = vsub.f32 %v1021_v58, %v2093_v27  ;;  %v1060_v2 = vsub.f32 %v1050_v1, %v2095_v29  ;;  %v1107_v3 = vsub.f32 %v1099_v57, %v2673_v41  ;;  %v1111_v4 = vsub.f32 %v1103_v15, %v2673_v41 }
 0x52f   :  { %v1091_v51 = vmax.f32 %v1083_v16, 0.0  ;;  %v1095_v59 = vmax.f32 %v1087_v11, 0.0 }
 0x530   :  { %v1066_v10 = vmul.f32 %v2667_v35, %v1056_v43  ;;  %v1070_v30 = vmul.f32 %v2667_v35, %v1060_v2  ;;  %v1115_v28 = vmax.f32 %v1107_v3, 0.0  ;;  %v1119_v60 = vmax.f32 %v1111_v4, 0.0 }
 0x532   :  { %v1074_v61 = vsub.f32 %v2629_v53, %v1066_v10  ;;  %v1078_v62 = vsub.f32 %v2631_v54, %v1070_v30  ;;  %v2735_v37 = vsub.f32 %v1091_v51, %v1115_v28  ;;  %v2737_v36 = vsub.f32 %v1095_v59, %v1119_v60 }
 0x534   :  { %v1084_v38 = vsub.f32 %v1074_v61, %v2673_v41  ;;  %v1100_v5 = vsub.f32 0.0, %v1074_v61  ;;  %v1088_v6 = vsub.f32 %v1078_v62, %v2673_v41  ;;  %v1104_v7 = vsub.f32 0.0, %v1078_v62  ;;  %1824 = vst.msk [vmem:[%s3243_s4 + $0xb0] sm:$0xff] %vm414_vm2, %v2735_v37 }
 0x535   :  { %1828 = vst.msk [vmem:[%s3243_s4 + $0x1f0] sm:$0xff] %vm414_vm2, %v2737_v36 }
 0x536   :  { %v1108_v53 = vsub.f32 %v1100_v5, %v2673_v41  ;;  %v1112_v54 = vsub.f32 %v1104_v7, %v2673_v41  ;;  %v1092_v35 = vmax.f32 %v1084_v38, 0.0  ;;  %v1096_v12 = vmax.f32 %v1088_v6, 0.0 }
 0x538   :  { %v1116_v44 = vmax.f32 %v1108_v53, 0.0  ;;  %v1120_v13 = vmax.f32 %v1112_v54, 0.0 }
 0x53a   :  { %v2753_v45 = vsub.f32 %v1092_v35, %v1116_v44  ;;  %v2755_v46 = vsub.f32 %v1096_v12, %v1120_v13 }
 0x53c   :  { %1825 = vst.msk [vmem:[%s3243_s4 + $0xb8] sm:$0xff] %vm414_vm2, %v2753_v45  ;;  %1150 = vmatpush.msra.mxu0 %v2753_v45  ;;  %1179 = vmatpush.msra.mxu1 %v2755_v46 }
 0x53d   :  { %1829 = vst.msk [vmem:[%s3243_s4 + $0x1f8] sm:$0xff] %vm414_vm2, %v2755_v46 }
 0x53e   :  { %1151 = vmatpush.msra.mxu0 %v2735_v37  ;;  %1180 = vmatpush.msra.mxu1 %v2737_v36 }
 0x540   :  { %1152 = vmatpush.msra.mxu0 %v2711_v39  ;;  %1181 = vmatpush.msra.mxu1 %v2713_v40 }
 0x542   :  { %1153 = vmatpush.msra.mxu0 %v2687_v47  ;;  %1182 = vmatpush.msra.mxu1 %v2689_v48 }
 0x543   :  { %1830 = vmatmul.msk.f32.vlgmr.msra.gmra.mxu0 %vm255_vm1, %v2007_v17  ;;  %1834 = vmatmul.msk.f32.vlgmr.msra.gmra.mxu1 %vm255_vm1, %v2009_v18 }
 0x54b   :  { %1831 = vmatmul.msk.f32.gmra.mxu0 %vm255_vm1, %v2015_v19  ;;  %1835 = vmatmul.msk.f32.gmra.mxu1 %vm255_vm1, %v2017_v20 }
 0x553   :  { %1832 = vmatmul.msk.f32.gmra.mxu0 %vm255_vm1, %v2023_v21  ;;  %1836 = vmatmul.msk.f32.gmra.mxu1 %vm255_vm1, %v2025_v22 }
 0x55b   :  { %1833 = vmatmul.msk.f32.gmra.mxu0 %vm255_vm1, %v2031_v23  ;;  %1837 = vmatmul.msk.f32.gmra.mxu1 %vm255_vm1, %v2033_v24 }
 0x5c0   :  { %v1155_v41 = vpop.f32.mrf.mxu0  ;;  %v1184_v63 = vpop.f32.mrf.mxu1 }
 0x5c1   :  { %v1196_v0 = vsub.f32 %v1155_v41, %v2039_v25  ;;  %v1200_v42 = vsub.f32 %v1184_v63, %v2041_v26 }
 0x5c3   :  { %v1206_v52 = vmul.f32 %v2791_v14, %v1196_v0  ;;  %v1210_v31 = vmul.f32 %v2791_v14, %v1200_v42 }
 0x5c5   :  { %v1214_v49 = vsub.f32 %v2687_v47, %v1206_v52  ;;  %v1218_v8 = vsub.f32 %v2689_v48, %v1210_v31 }
 0x5c7   :  { %v1240_v9 = vsub.f32 0.0, %v1214_v49  ;;  %v1244_v50 = vsub.f32 0.0, %v1218_v8  ;;  %v1224_v57 = vsub.f32 %v1214_v49, %v2797_v34  ;;  %v1228_v58 = vsub.f32 %v1218_v8, %v2797_v34 }
 0x5c8   :  { %v1158_v15 = vpop.f32.mrf.mxu0  ;;  %v1187_v16 = vpop.f32.mrf.mxu1 }
 0x5c9   :  { %v1197_v1 = vsub.f32 %v1158_v15, %v2047_v32  ;;  %v1201_v11 = vsub.f32 %v1187_v16, %v2049_v33  ;;  %v1248_v43 = vsub.f32 %v1240_v9, %v2797_v34  ;;  %v1252_v2 = vsub.f32 %v1244_v50, %v2797_v34 }
 0x5ca   :  { %v1232_v3 = vmax.f32 %v1224_v57, 0.0  ;;  %v1236_v10 = vmax.f32 %v1228_v58, 0.0 }
 0x5cb   :  { %v1207_v47 = vmul.f32 %v2791_v14, %v1197_v1  ;;  %v1211_v48 = vmul.f32 %v2791_v14, %v1201_v11  ;;  %v1256_v4 = vmax.f32 %v1248_v43, 0.0  ;;  %v1260_v30 = vmax.f32 %v1252_v2, 0.0 }
 0x5cd   :  { %v1215_v51 = vsub.f32 %v2711_v39, %v1207_v47  ;;  %v1219_v28 = vsub.f32 %v2713_v40, %v1211_v48  ;;  %v2811_v59 = vsub.f32 %v1232_v3, %v1256_v4  ;;  %v2813_v60 = vsub.f32 %v1236_v10, %v1260_v30 }
 0x5cf   :  { %v1241_v61 = vsub.f32 0.0, %v1215_v51  ;;  %v1245_v62 = vsub.f32 0.0, %v1219_v28  ;;  %v1225_v38 = vsub.f32 %v1215_v51, %v2797_v34  ;;  %1840 = vst.msk [vmem:[%s3243_s4 + $0xc0] sm:$0xff] %vm414_vm2, %v2811_v59  ;;  %v1229_v39 = vsub.f32 %v1219_v28, %v2797_v34 }
 0x5d0   :  { %v1161_v5 = vpop.f32.mrf.mxu0  ;;  %v1190_v6 = vpop.f32.mrf.mxu1  ;;  %1844 = vst.msk [vmem:[%s3243_s4 + $0x200] sm:$0xff] %vm414_vm2, %v2813_v60 }
 0x5d1   :  { %v1198_v40 = vsub.f32 %v1161_v5, %v2063_v55  ;;  %v1202_v7 = vsub.f32 %v1190_v6, %v2065_v56  ;;  %v1249_v53 = vsub.f32 %v1241_v61, %v2797_v34  ;;  %v1253_v54 = vsub.f32 %v1245_v62, %v2797_v34 }
 0x5d2   :  { %v1233_v12 = vmax.f32 %v1225_v38, 0.0  ;;  %v1237_v41 = vmax.f32 %v1229_v39, 0.0 }
 0x5d3   :  { %v1208_v35 = vmul.f32 %v2791_v14, %v1198_v40  ;;  %v1212_v44 = vmul.f32 %v2791_v14, %v1202_v7  ;;  %v1257_v13 = vmax.f32 %v1249_v53, 0.0  ;;  %v1261_v63 = vmax.f32 %v1253_v54, 0.0 }
 0x5d4   :  { %v2915_v7 = vstv %s1856_s15 }
 0x5d5   :  { %v1216_v0 = vsub.f32 %v2735_v37, %v1208_v35  ;;  %v1220_v42 = vsub.f32 %v2737_v36, %v1212_v44  ;;  %v2835_v52 = vsub.f32 %v1233_v12, %v1257_v13  ;;  %v2837_v31 = vsub.f32 %v1237_v41, %v1261_v63 }
 0x5d6   :  { %v2921_v13 = vstv %s1857_s16 }
 0x5d7   :  { %v1242_v49 = vsub.f32 0.0, %v1216_v0  ;;  %v1246_v8 = vsub.f32 0.0, %v1220_v42  ;;  %v1226_v9 = vsub.f32 %v1216_v0, %v2797_v34  ;;  %1841 = vst.msk [vmem:[%s3243_s4 + $0xc8] sm:$0xff] %vm414_vm2, %v2835_v52  ;;  %v1230_v37 = vsub.f32 %v1220_v42, %v2797_v34 }
 0x5d8   :  { %v1164_v50 = vpop.f32.mrf.mxu0  ;;  %v1193_v57 = vpop.f32.mrf.mxu1  ;;  %1845 = vst.msk [vmem:[%s3243_s4 + $0x208] sm:$0xff] %vm414_vm2, %v2837_v31 }
 0x5d9   :  { %v1199_v36 = vsub.f32 %v1164_v50, %v2093_v27  ;;  %v1203_v15 = vsub.f32 %v1193_v57, %v2095_v29  ;;  %v1250_v16 = vsub.f32 %v1242_v49, %v2797_v34  ;;  %v1254_v58 = vsub.f32 %v1246_v8, %v2797_v34 }
 0x5da   :  { %v1234_v43 = vmax.f32 %v1226_v9, 0.0  ;;  %v1238_v47 = vmax.f32 %v1230_v37, 0.0 }
 0x5db   :  { %v1209_v1 = vmul.f32 %v2791_v14, %v1199_v36  ;;  %v1213_v11 = vmul.f32 %v2791_v14, %v1203_v15  ;;  %v1258_v2 = vmax.f32 %v1250_v16, 0.0  ;;  %v1262_v48 = vmax.f32 %v1254_v58, 0.0 }
 0x5dd   :  { %v1217_v3 = vsub.f32 %v2753_v45, %v1209_v1  ;;  %v1221_v4 = vsub.f32 %v2755_v46, %v1213_v11  ;;  %v2859_v10 = vsub.f32 %v1234_v43, %v1258_v2  ;;  %v2861_v30 = vsub.f32 %v1238_v47, %v1262_v48 }
 0x5df   :  { %v1227_v51 = vsub.f32 %v1217_v3, %v2797_v34  ;;  %v1243_v28 = vsub.f32 0.0, %v1217_v3  ;;  %v1231_v61 = vsub.f32 %v1221_v4, %v2797_v34  ;;  %v1247_v62 = vsub.f32 0.0, %v1221_v4  ;;  %1842 = vst.msk [vmem:[%s3243_s4 + $0xd0] sm:$0xff] %vm414_vm2, %v2859_v10 }
 0x5e0   :  { %1846 = vst.msk [vmem:[%s3243_s4 + $0x210] sm:$0xff] %vm414_vm2, %v2861_v30 }
 0x5e1   :  { %v1251_v45 = vsub.f32 %v1243_v28, %v2797_v34  ;;  %v1255_v46 = vsub.f32 %v1247_v62, %v2797_v34  ;;  %v1235_v14 = vmax.f32 %v1227_v51, 0.0  ;;  %v1239_v5 = vmax.f32 %v1231_v61, 0.0 }
 0x5e3   :  { %v1259_v38 = vmax.f32 %v1251_v45, 0.0  ;;  %v1263_v6 = vmax.f32 %v1255_v46, 0.0 }
 0x5e5   :  { %v2877_v39 = vsub.f32 %v1235_v14, %v1259_v38  ;;  %v2879_v40 = vsub.f32 %v1239_v5, %v1263_v6 }
 0x5e7   :  { %1843 = vst.msk [vmem:[%s3243_s4 + $0xd8] sm:$0xff] %vm414_vm2, %v2877_v39  ;;  %1293 = vmatpush.msra.mxu2 %v2877_v39  ;;  %1322 = vmatpush.msra.mxu3 %v2879_v40 }
 0x5e8   :  { %1847 = vst.msk [vmem:[%s3243_s4 + $0x218] sm:$0xff] %vm414_vm2, %v2879_v40 }
 0x5e9   :  { %1294 = vmatpush.msra.mxu2 %v2859_v10  ;;  %1323 = vmatpush.msra.mxu3 %v2861_v30 }
 0x5eb   :  { %1295 = vmatpush.msra.mxu2 %v2835_v52  ;;  %1324 = vmatpush.msra.mxu3 %v2837_v31 }
 0x5ed   :  { %1296 = vmatpush.msra.mxu2 %v2811_v59  ;;  %1325 = vmatpush.msra.mxu3 %v2813_v60 }
 0x5ee   :  { %1848 = vmatmul.msk.f32.vlgmr.msra.gmra.mxu2 %vm255_vm1, %v2007_v17  ;;  %1852 = vmatmul.msk.f32.vlgmr.msra.gmra.mxu3 %vm255_vm1, %v2009_v18 }
 0x5f6   :  { %1849 = vmatmul.msk.f32.gmra.mxu2 %vm255_vm1, %v2015_v19  ;;  %1853 = vmatmul.msk.f32.gmra.mxu3 %vm255_vm1, %v2017_v20 }
 0x5fe   :  { %1850 = vmatmul.msk.f32.gmra.mxu2 %vm255_vm1, %v2023_v21  ;;  %1854 = vmatmul.msk.f32.gmra.mxu3 %vm255_vm1, %v2025_v22 }
 0x606   :  { %1851 = vmatmul.msk.f32.gmra.mxu2 %vm255_vm1, %v2031_v23  ;;  %1855 = vmatmul.msk.f32.gmra.mxu3 %vm255_vm1, %v2033_v24 }
 0x671   :  { %v1298_v34 = vpop.f32.mrf.mxu2  ;;  %v1327_v53 = vpop.f32.mrf.mxu3 }
 0x672   :  { %v1339_v54 = vsub.f32 %v1298_v34, %v2039_v25  ;;  %v1343_v35 = vsub.f32 %v1327_v53, %v2041_v26 }
 0x674   :  { %v1349_v44 = vmul.f32 %v2915_v7, %v1339_v54  ;;  %v1353_v12 = vmul.f32 %v2915_v7, %v1343_v35 }
 0x676   :  { %v1357_v41 = vsub.f32 %v2811_v59, %v1349_v44  ;;  %v1361_v63 = vsub.f32 %v2813_v60, %v1353_v12 }
 0x678   :  { %v1383_v0 = vsub.f32 0.0, %v1357_v41  ;;  %v1387_v42 = vsub.f32 0.0, %v1361_v63  ;;  %v1367_v49 = vsub.f32 %v1357_v41, %v2921_v13  ;;  %v1371_v50 = vsub.f32 %v1361_v63, %v2921_v13 }
 0x679   :  { %v1301_v8 = vpop.f32.mrf.mxu2  ;;  %v1330_v9 = vpop.f32.mrf.mxu3 }
 0x67a   :  { %v1340_v57 = vsub.f32 %v1301_v8, %v2047_v32  ;;  %v1344_v37 = vsub.f32 %v1330_v9, %v2049_v33  ;;  %v1391_v36 = vsub.f32 %v1383_v0, %v2921_v13  ;;  %v1395_v15 = vsub.f32 %v1387_v42, %v2921_v13 }
 0x67b   :  { %v1375_v16 = vmax.f32 %v1367_v49, 0.0  ;;  %v1379_v1 = vmax.f32 %v1371_v50, 0.0 }
 0x67c   :  { %v1350_v59 = vmul.f32 %v2915_v7, %v1340_v57  ;;  %v1354_v60 = vmul.f32 %v2915_v7, %v1344_v37  ;;  %v1399_v58 = vmax.f32 %v1391_v36, 0.0  ;;  %v1403_v11 = vmax.f32 %v1395_v15, 0.0 }
 0x67e   :  { %v1358_v43 = vsub.f32 %v2835_v52, %v1350_v59  ;;  %v1362_v2 = vsub.f32 %v2837_v31, %v1354_v60  ;;  %v2935_v47 = vsub.f32 %v1375_v16, %v1399_v58  ;;  %v2937_v48 = vsub.f32 %v1379_v1, %v1403_v11 }
 0x680   :  { %v1384_v3 = vsub.f32 0.0, %v1358_v43  ;;  %v1388_v4 = vsub.f32 0.0, %v1362_v2  ;;  %v1368_v51 = vsub.f32 %v1358_v43, %v2921_v13  ;;  %1858 = vst.msk [vmem:[%s3243_s4 + $0xe0] sm:$0xff] %vm414_vm2, %v2935_v47  ;;  %v1372_v52 = vsub.f32 %v1362_v2, %v2921_v13 }
 0x681   :  { %v1304_v28 = vpop.f32.mrf.mxu2  ;;  %v1333_v61 = vpop.f32.mrf.mxu3  ;;  %1862 = vst.msk [vmem:[%s3243_s4 + $0x220] sm:$0xff] %vm414_vm2, %v2937_v48 }
 0x682   :  { %v1341_v31 = vsub.f32 %v1304_v28, %v2063_v55  ;;  %v1345_v62 = vsub.f32 %v1333_v61, %v2065_v56  ;;  %v1392_v45 = vsub.f32 %v1384_v3, %v2921_v13  ;;  %v1396_v46 = vsub.f32 %v1388_v4, %v2921_v13 }
 0x683   :  { %v1376_v5 = vmax.f32 %v1368_v51, 0.0  ;;  %v1380_v34 = vmax.f32 %v1372_v52, 0.0 }
 0x684   :  { %v1351_v14 = vmul.f32 %v2915_v7, %v1341_v31  ;;  %v1355_v38 = vmul.f32 %v2915_v7, %v1345_v62  ;;  %v1400_v6 = vmax.f32 %v1392_v45, 0.0  ;;  %v1404_v53 = vmax.f32 %v1396_v46, 0.0 }
 0x685   :  { %v3039_v62 = vstv %s1874_s5 }
 0x686   :  { %v1359_v54 = vsub.f32 %v2859_v10, %v1351_v14  ;;  %v1363_v35 = vsub.f32 %v2861_v30, %v1355_v38  ;;  %v2959_v44 = vsub.f32 %v1376_v5, %v1400_v6  ;;  %v2961_v12 = vsub.f32 %v1380_v34, %v1404_v53 }
 0x687   :  { %v3045_v6 = vstv %s1875_s6 }
 0x688   :  { %v1385_v41 = vsub.f32 0.0, %v1359_v54  ;;  %v1389_v63 = vsub.f32 0.0, %v1363_v35  ;;  %v1369_v0 = vsub.f32 %v1359_v54, %v2921_v13  ;;  %1859 = vst.msk [vmem:[%s3243_s4 + $0xe8] sm:$0xff] %vm414_vm2, %v2959_v44  ;;  %v1373_v10 = vsub.f32 %v1363_v35, %v2921_v13 }
 0x689   :  { %v1307_v42 = vpop.f32.mrf.mxu2  ;;  %v1336_v49 = vpop.f32.mrf.mxu3  ;;  %1863 = vst.msk [vmem:[%s3243_s4 + $0x228] sm:$0xff] %vm414_vm2, %v2961_v12 }
 0x68a   :  { %v1342_v30 = vsub.f32 %v1307_v42, %v2093_v27  ;;  %v1346_v8 = vsub.f32 %v1336_v49, %v2095_v29  ;;  %v1393_v9 = vsub.f32 %v1385_v41, %v2921_v13  ;;  %v1397_v50 = vsub.f32 %v1389_v63, %v2921_v13 }
 0x68b   :  { %v1377_v36 = vmax.f32 %v1369_v0, 0.0  ;;  %v1381_v59 = vmax.f32 %v1373_v10, 0.0 }
 0x68c   :  { %v1352_v57 = vmul.f32 %v2915_v7, %v1342_v30  ;;  %v1356_v37 = vmul.f32 %v2915_v7, %v1346_v8  ;;  %v1401_v15 = vmax.f32 %v1393_v9, 0.0  ;;  %v1405_v60 = vmax.f32 %v1397_v50, 0.0 }
 0x68e   :  { %v1360_v16 = vsub.f32 %v2877_v39, %v1352_v57  ;;  %v1364_v58 = vsub.f32 %v2879_v40, %v1356_v37  ;;  %v2983_v1 = vsub.f32 %v1377_v36, %v1401_v15  ;;  %v2985_v11 = vsub.f32 %v1381_v59, %v1405_v60 }
 0x690   :  { %v1370_v43 = vsub.f32 %v1360_v16, %v2921_v13  ;;  %v1386_v2 = vsub.f32 0.0, %v1360_v16  ;;  %v1374_v3 = vsub.f32 %v1364_v58, %v2921_v13  ;;  %v1390_v4 = vsub.f32 0.0, %v1364_v58  ;;  %1860 = vst.msk [vmem:[%s3243_s4 + $0xf0] sm:$0xff] %vm414_vm2, %v2983_v1 }
 0x691   :  { %1864 = vst.msk [vmem:[%s3243_s4 + $0x230] sm:$0xff] %vm414_vm2, %v2985_v11 }
 0x692   :  { %v1394_v39 = vsub.f32 %v1386_v2, %v2921_v13  ;;  %v1398_v40 = vsub.f32 %v1390_v4, %v2921_v13  ;;  %v1378_v7 = vmax.f32 %v1370_v43, 0.0  ;;  %v1382_v28 = vmax.f32 %v1374_v3, 0.0 }
 0x694   :  { %v1402_v51 = vmax.f32 %v1394_v39, 0.0  ;;  %v1406_v61 = vmax.f32 %v1398_v40, 0.0 }
 0x696   :  { %v3001_v52 = vsub.f32 %v1378_v7, %v1402_v51  ;;  %v3003_v31 = vsub.f32 %v1382_v28, %v1406_v61 }
 0x698   :  { %1861 = vst.msk [vmem:[%s3243_s4 + $0xf8] sm:$0xff] %vm414_vm2, %v3001_v52  ;;  %1436 = vmatpush.msrb.mxu0 %v3001_v52  ;;  %1465 = vmatpush.msrb.mxu1 %v3003_v31 }
 0x699   :  { %1865 = vst.msk [vmem:[%s3243_s4 + $0x238] sm:$0xff] %vm414_vm2, %v3003_v31 }
 0x69a   :  { %1437 = vmatpush.msrb.mxu0 %v2983_v1  ;;  %1466 = vmatpush.msrb.mxu1 %v2985_v11 }
 0x69c   :  { %1438 = vmatpush.msrb.mxu0 %v2959_v44  ;;  %1467 = vmatpush.msrb.mxu1 %v2961_v12 }
 0x69e   :  { %1439 = vmatpush.msrb.mxu0 %v2935_v47  ;;  %1468 = vmatpush.msrb.mxu1 %v2937_v48 }
 0x69f   :  { %1866 = vmatmul.msk.f32.vlgmr.msrb.gmra.mxu0 %vm255_vm1, %v2007_v17  ;;  %1870 = vmatmul.msk.f32.vlgmr.msrb.gmra.mxu1 %vm255_vm1, %v2009_v18 }
 0x6a7   :  { %1867 = vmatmul.msk.f32.gmra.mxu0 %vm255_vm1, %v2015_v19  ;;  %1871 = vmatmul.msk.f32.gmra.mxu1 %vm255_vm1, %v2017_v20 }
 0x6af   :  { %1868 = vmatmul.msk.f32.gmra.mxu0 %vm255_vm1, %v2023_v21  ;;  %1872 = vmatmul.msk.f32.gmra.mxu1 %vm255_vm1, %v2025_v22 }
 0x6b7   :  { %1869 = vmatmul.msk.f32.gmra.mxu0 %vm255_vm1, %v2031_v23  ;;  %1873 = vmatmul.msk.f32.gmra.mxu1 %vm255_vm1, %v2033_v24 }
 0x71c   :  { %v1441_v13 = vpop.f32.mrf.mxu0  ;;  %v1470_v45 = vpop.f32.mrf.mxu1 }
 0x71d   :  { %v1482_v46 = vsub.f32 %v1441_v13, %v2039_v25  ;;  %v1486_v14 = vsub.f32 %v1470_v45, %v2041_v26 }
 0x71f   :  { %v1492_v38 = vmul.f32 %v3039_v62, %v1482_v46  ;;  %v1496_v5 = vmul.f32 %v3039_v62, %v1486_v14 }
 0x721   :  { %v1500_v34 = vsub.f32 %v2935_v47, %v1492_v38  ;;  %v1504_v53 = vsub.f32 %v2937_v48, %v1496_v5 }
 0x723   :  { %v1526_v54 = vsub.f32 0.0, %v1500_v34  ;;  %v1530_v35 = vsub.f32 0.0, %v1504_v53  ;;  %v1510_v41 = vsub.f32 %v1500_v34, %v3045_v6  ;;  %v1514_v42 = vsub.f32 %v1504_v53, %v3045_v6 }
 0x724   :  { %v1444_v63 = vpop.f32.mrf.mxu0  ;;  %v1473_v0 = vpop.f32.mrf.mxu1 }
 0x725   :  { %v1483_v49 = vsub.f32 %v1444_v63, %v2047_v32  ;;  %v1487_v10 = vsub.f32 %v1473_v0, %v2049_v33  ;;  %v1534_v30 = vsub.f32 %v1526_v54, %v3045_v6  ;;  %v1538_v8 = vsub.f32 %v1530_v35, %v3045_v6 }
 0x726   :  { %v1518_v9 = vmax.f32 %v1510_v41, 0.0  ;;  %v1522_v57 = vmax.f32 %v1514_v42, 0.0 }
 0x727   :  { %v1493_v47 = vmul.f32 %v3039_v62, %v1483_v49  ;;  %v1497_v48 = vmul.f32 %v3039_v62, %v1487_v10  ;;  %v1542_v50 = vmax.f32 %v1534_v30, 0.0  ;;  %v1546_v37 = vmax.f32 %v1538_v8, 0.0 }
 0x729   :  { %v1501_v36 = vsub.f32 %v2959_v44, %v1493_v47  ;;  %v1505_v15 = vsub.f32 %v2961_v12, %v1497_v48  ;;  %v3059_v59 = vsub.f32 %v1518_v9, %v1542_v50  ;;  %v3061_v60 = vsub.f32 %v1522_v57, %v1546_v37 }
 0x72b   :  { %v1527_v16 = vsub.f32 0.0, %v1501_v36  ;;  %v1531_v58 = vsub.f32 0.0, %v1505_v15  ;;  %v1511_v43 = vsub.f32 %v1501_v36, %v3045_v6  ;;  %1876 = vst.msk [vmem:[%s3243_s4 + $0x100] sm:$0xff] %vm414_vm2, %v3059_v59  ;;  %v1515_v44 = vsub.f32 %v1505_v15, %v3045_v6 }
 0x72c   :  { %v1447_v2 = vpop.f32.mrf.mxu0  ;;  %v1476_v3 = vpop.f32.mrf.mxu1  ;;  %1880 = vst.msk [vmem:[%s3243_s4 + $0x240] sm:$0xff] %vm414_vm2, %v3061_v60 }
 0x72d   :  { %v1484_v12 = vsub.f32 %v1447_v2, %v2063_v55  ;;  %v1488_v4 = vsub.f32 %v1476_v3, %v2065_v56  ;;  %v1535_v39 = vsub.f32 %v1527_v16, %v3045_v6  ;;  %v1539_v40 = vsub.f32 %v1531_v58, %v3045_v6 }
 0x72e   :  { %v1519_v28 = vmax.f32 %v1511_v43, 0.0  ;;  %v1523_v13 = vmax.f32 %v1515_v44, 0.0 }
 0x72f   :  { %v1494_v7 = vmul.f32 %v3039_v62, %v1484_v12  ;;  %v1498_v51 = vmul.f32 %v3039_v62, %v1488_v4  ;;  %v1543_v61 = vmax.f32 %v1535_v39, 0.0  ;;  %v1547_v45 = vmax.f32 %v1539_v40, 0.0 }
 0x730   :  { %v3169_v4 = vstv %s1893_s22 }
 0x731   :  { %v1502_v46 = vsub.f32 %v2983_v1, %v1494_v7  ;;  %v1506_v14 = vsub.f32 %v2985_v11, %v1498_v51  ;;  %v3083_v38 = vsub.f32 %v1519_v28, %v1543_v61  ;;  %v3085_v5 = vsub.f32 %v1523_v13, %v1547_v45 }
 0x733   :  { %v1528_v34 = vsub.f32 0.0, %v1502_v46  ;;  %v1532_v53 = vsub.f32 0.0, %v1506_v14  ;;  %v1512_v54 = vsub.f32 %v1502_v46, %v3045_v6  ;;  %1877 = vst.msk [vmem:[%s3243_s4 + $0x108] sm:$0xff] %vm414_vm2, %v3083_v38  ;;  %v1516_v1 = vsub.f32 %v1506_v14, %v3045_v6 }
 0x734   :  { %v1450_v35 = vpop.f32.mrf.mxu0  ;;  %v1479_v41 = vpop.f32.mrf.mxu1  ;;  %1881 = vst.msk [vmem:[%s3243_s4 + $0x248] sm:$0xff] %vm414_vm2, %v3085_v5 }
 0x735   :  { %v1485_v11 = vsub.f32 %v1450_v35, %v2093_v27  ;;  %v1489_v63 = vsub.f32 %v1479_v41, %v2095_v29  ;;  %v1536_v0 = vsub.f32 %v1528_v34, %v3045_v6  ;;  %v1540_v42 = vsub.f32 %v1532_v53, %v3045_v6 }
 0x736   :  { %v1520_v30 = vmax.f32 %v1512_v54, 0.0  ;;  %v1524_v47 = vmax.f32 %v1516_v1, 0.0 }
 0x737   :  { %v1495_v49 = vmul.f32 %v3039_v62, %v1485_v11  ;;  %v1499_v10 = vmul.f32 %v3039_v62, %v1489_v63  ;;  %v1544_v8 = vmax.f32 %v1536_v0, 0.0  ;;  %v1548_v48 = vmax.f32 %v1540_v42, 0.0 }
 0x739   :  { %v1503_v9 = vsub.f32 %v3001_v52, %v1495_v49  ;;  %v1507_v50 = vsub.f32 %v3003_v31, %v1499_v10  ;;  %v3107_v57 = vsub.f32 %v1520_v30, %v1544_v8  ;;  %v3109_v37 = vsub.f32 %v1524_v47, %v1548_v48 }
 0x73b   :  { %v1513_v36 = vsub.f32 %v1503_v9, %v3045_v6  ;;  %v1529_v15 = vsub.f32 0.0, %v1503_v9  ;;  %v1517_v16 = vsub.f32 %v1507_v50, %v3045_v6  ;;  %v1533_v58 = vsub.f32 0.0, %v1507_v50  ;;  %1878 = vst.msk [vmem:[%s3243_s4 + $0x110] sm:$0xff] %vm414_vm2, %v3107_v57 }
 0x73c   :  { %1882 = vst.msk [vmem:[%s3243_s4 + $0x250] sm:$0xff] %vm414_vm2, %v3109_v37 }
 0x73d   :  { %v1537_v52 = vsub.f32 %v1529_v15, %v3045_v6  ;;  %v1541_v31 = vsub.f32 %v1533_v58, %v3045_v6  ;;  %v1521_v62 = vmax.f32 %v1513_v36, 0.0  ;;  %v1525_v2 = vmax.f32 %v1517_v16, 0.0 }
 0x73f   :  { %v1545_v43 = vmax.f32 %v1537_v52, 0.0  ;;  %v1549_v3 = vmax.f32 %v1541_v31, 0.0 }
 0x741   :  { %v3125_v44 = vsub.f32 %v1521_v62, %v1545_v43  ;;  %v3127_v12 = vsub.f32 %v1525_v2, %v1549_v3 }
 0x743   :  { %1879 = vst.msk [vmem:[%s3243_s4 + $0x118] sm:$0xff] %vm414_vm2, %v3125_v44  ;;  %1579 = vmatpush.msrb.mxu2 %v3125_v44  ;;  %1608 = vmatpush.msrb.mxu3 %v3127_v12 }
 0x744   :  { %1883 = vst.msk [vmem:[%s3243_s4 + $0x258] sm:$0xff] %vm414_vm2, %v3127_v12 }
 0x745   :  { %1580 = vmatpush.msrb.mxu2 %v3107_v57  ;;  %1609 = vmatpush.msrb.mxu3 %v3109_v37 }
 0x747   :  { %1581 = vmatpush.msrb.mxu2 %v3083_v38  ;;  %1610 = vmatpush.msrb.mxu3 %v3085_v5 }
 0x749   :  { %1582 = vmatpush.msrb.mxu2 %v3059_v59  ;;  %1611 = vmatpush.msrb.mxu3 %v3061_v60 }
 0x74a   :  { %1884 = vmatmul.msk.f32.vlgmr.msrb.gmra.mxu2 %vm255_vm1, %v2007_v17  ;;  %1888 = vmatmul.msk.f32.vlgmr.msrb.gmra.mxu3 %vm255_vm1, %v2009_v18  ;;  %v3163_v18 = vstv %s1892_s21 }
 0x752   :  { %1885 = vmatmul.msk.f32.gmra.mxu2 %vm255_vm1, %v2015_v19  ;;  %1889 = vmatmul.msk.f32.gmra.mxu3 %vm255_vm1, %v2017_v20 }
 0x75a   :  { %1886 = vmatmul.msk.f32.gmra.mxu2 %vm255_vm1, %v2023_v21  ;;  %1890 = vmatmul.msk.f32.gmra.mxu3 %vm255_vm1, %v2025_v22 }
 0x762   :  { %1887 = vmatmul.msk.f32.gmra.mxu2 %vm255_vm1, %v2031_v23  ;;  %1891 = vmatmul.msk.f32.gmra.mxu3 %vm255_vm1, %v2033_v24 }
 0x7cd   :  { %v1584_v17 = vpop.f32.mrf.mxu2  ;;  %v1613_v19 = vpop.f32.mrf.mxu3 }
 0x7ce   :  { %v1625_v20 = vsub.f32 %v1584_v17, %v2039_v25  ;;  %v1629_v6 = vsub.f32 %v1613_v19, %v2041_v26 }
 0x7d0   :  { %v1635_v21 = vmul.f32 %v3163_v18, %v1625_v20  ;;  %v1639_v22 = vmul.f32 %v3163_v18, %v1629_v6 }
 0x7d2   :  { %v1643_v23 = vsub.f32 %v3059_v59, %v1635_v21  ;;  %v1647_v24 = vsub.f32 %v3061_v60, %v1639_v22 }
 0x7d4   :  { %v1653_v39 = vsub.f32 %v1643_v23, %v3169_v4  ;;  %v1669_v40 = vsub.f32 0.0, %v1643_v23  ;;  %v1657_v7 = vsub.f32 %v1647_v24, %v3169_v4  ;;  %v1673_v51 = vsub.f32 0.0, %v1647_v24 }
 0x7d5   :  { %v1587_v28 = vpop.f32.mrf.mxu2  ;;  %v1616_v25 = vpop.f32.mrf.mxu3 }
 0x7d6   :  { %v1677_v26 = vsub.f32 %v1669_v40, %v3169_v4  ;;  %v1681_v61 = vsub.f32 %v1673_v51, %v3169_v4  ;;  %v1626_v13 = vsub.f32 %v1587_v28, %v2047_v32  ;;  %v1630_v45 = vsub.f32 %v1616_v25, %v2049_v33 }
 0x7d7   :  { %v1661_v46 = vmax.f32 %v1653_v39, 0.0  ;;  %v1665_v14 = vmax.f32 %v1657_v7, 0.0 }
 0x7d8   :  { %v1685_v59 = vmax.f32 %v1677_v26, 0.0  ;;  %v1689_v60 = vmax.f32 %v1681_v61, 0.0  ;;  %v1636_v34 = vmul.f32 %v3163_v18, %v1626_v13  ;;  %v1640_v53 = vmul.f32 %v3163_v18, %v1630_v45 }
 0x7da   :  { %v1693_v54 = vsub.f32 %v1661_v46, %v1685_v59  ;;  %v1697_v35 = vsub.f32 %v1665_v14, %v1689_v60  ;;  %v1644_v41 = vsub.f32 %v3083_v38, %v1636_v34  ;;  %v1648_v1 = vsub.f32 %v3085_v5, %v1640_v53 }
 0x7dc   :  { %1894 = vst.msk [vmem:[%s3243_s4 + $0x120] sm:$0xff] %vm414_vm2, %v1693_v54  ;;  %v1654_v32 = vsub.f32 %v1644_v41, %v3169_v4  ;;  %v1670_v33 = vsub.f32 0.0, %v1644_v41  ;;  %v1658_v11 = vsub.f32 %v1648_v1, %v3169_v4  ;;  %v1674_v63 = vsub.f32 0.0, %v1648_v1 }
 0x7dd   :  { %1898 = vst.msk [vmem:[%s3243_s4 + $0x260] sm:$0xff] %vm414_vm2, %v1697_v35  ;;  %v1590_v0 = vpop.f32.mrf.mxu2  ;;  %v1619_v38 = vpop.f32.mrf.mxu3 }
 0x7de   :  { %v1627_v5 = vsub.f32 %v1590_v0, %v2063_v55  ;;  %v1631_v42 = vsub.f32 %v1619_v38, %v2065_v56  ;;  %v1678_v49 = vsub.f32 %v1670_v33, %v3169_v4  ;;  %v1682_v10 = vsub.f32 %v1674_v63, %v3169_v4 }
 0x7df   :  { %v1662_v47 = vmax.f32 %v1654_v32, 0.0  ;;  %v1666_v9 = vmax.f32 %v1658_v11, 0.0 }
 0x7e0   :  { %v1637_v30 = vmul.f32 %v3163_v18, %v1627_v5  ;;  %v1641_v8 = vmul.f32 %v3163_v18, %v1631_v42  ;;  %v1686_v48 = vmax.f32 %v1678_v49, 0.0  ;;  %v1690_v50 = vmax.f32 %v1682_v10, 0.0 }
 0x7e2   :  { %v1645_v36 = vsub.f32 %v3107_v57, %v1637_v30  ;;  %v1649_v15 = vsub.f32 %v3109_v37, %v1641_v8  ;;  %v1694_v16 = vsub.f32 %v1662_v47, %v1686_v48  ;;  %v1698_v55 = vsub.f32 %v1666_v9, %v1690_v50 }
 0x7e4   :  { %v1655_v56 = vsub.f32 %v1645_v36, %v3169_v4  ;;  %v1671_v58 = vsub.f32 0.0, %v1645_v36  ;;  %v1659_v52 = vsub.f32 %v1649_v15, %v3169_v4  ;;  %v1675_v31 = vsub.f32 0.0, %v1649_v15  ;;  %1895 = vst.msk [vmem:[%s3243_s4 + $0x128] sm:$0xff] %vm414_vm2, %v1694_v16 }
 0x7e5   :  { %v1593_v62 = vpop.f32.mrf.mxu2  ;;  %v1622_v43 = vpop.f32.mrf.mxu3  ;;  %1899 = vst.msk [vmem:[%s3243_s4 + $0x268] sm:$0xff] %vm414_vm2, %v1698_v55 }
 0x7e6   :  { %v1679_v57 = vsub.f32 %v1671_v58, %v3169_v4  ;;  %v1683_v37 = vsub.f32 %v1675_v31, %v3169_v4  ;;  %v1628_v2 = vsub.f32 %v1593_v62, %v2093_v27  ;;  %v1632_v3 = vsub.f32 %v1622_v43, %v2095_v29 }
 0x7e7   :  { %v1663_v17 = vmax.f32 %v1655_v56, 0.0  ;;  %v1667_v20 = vmax.f32 %v1659_v52, 0.0 }
 0x7e8   :  { %v1687_v19 = vmax.f32 %v1679_v57, 0.0  ;;  %v1691_v6 = vmax.f32 %v1683_v37, 0.0  ;;  %v1638_v21 = vmul.f32 %v3163_v18, %v1628_v2  ;;  %v1642_v22 = vmul.f32 %v3163_v18, %v1632_v3 }
 0x7ea   :  { %v1695_v23 = vsub.f32 %v1663_v17, %v1687_v19  ;;  %v1699_v24 = vsub.f32 %v1667_v20, %v1691_v6  ;;  %v1646_v39 = vsub.f32 %v3125_v44, %v1638_v21  ;;  %v1650_v40 = vsub.f32 %v3127_v12, %v1642_v22 }
 0x7ec   :  { %1896 = vst.msk [vmem:[%s3243_s4 + $0x130] sm:$0xff] %vm414_vm2, %v1695_v23  ;;  %v1656_v27 = vsub.f32 %v1646_v39, %v3169_v4  ;;  %v1672_v29 = vsub.f32 0.0, %v1646_v39  ;;  %v1660_v18 = vsub.f32 %v1650_v40, %v3169_v4  ;;  %v1676_v7 = vsub.f32 0.0, %v1650_v40 }
 0x7ed   :  { %1900 = vst.msk [vmem:[%s3243_s4 + $0x270] sm:$0xff] %vm414_vm2, %v1699_v24 }
 0x7ee   :  { %v1680_v44 = vsub.f32 %v1672_v29, %v3169_v4  ;;  %v1684_v12 = vsub.f32 %v1676_v7, %v3169_v4  ;;  %v1664_v51 = vmax.f32 %v1656_v27, 0.0  ;;  %v1668_v25 = vmax.f32 %v1660_v18, 0.0 }
 0x7f0   :  { %v1688_v28 = vmax.f32 %v1680_v44, 0.0  ;;  %v1692_v26 = vmax.f32 %v1684_v12, 0.0 }
 0x7f2   :  { %v1696_v61 = vsub.f32 %v1664_v51, %v1688_v28  ;;  %v1700_v13 = vsub.f32 %v1668_v25, %v1692_v26 }
 0x7f4   :  { %1897 = vst.msk [vmem:[%s3243_s4 + $0x138] sm:$0xff] %vm414_vm2, %v1696_v61 }
 0x7f5   :  { %1901 = vst.msk [vmem:[%s3243_s4 + $0x278] sm:$0xff] %vm414_vm2, %v1700_v13 }
 0x7f6   :  { %1714 = vsyncpa [#allocation3], 1 }
 0x7f7   :  { %1715 = vsyncpa [#allocation5], 1 }

</bundles_post_ra>
